<compile_context>
chip_gen: v5e
topology: v5e:2x2
jax: 0.10.0
libtpu: 0.0.40
codegen_flags: <defaults>
</compile_context>

<pallas_src>
import functools
import random

import jax
import jax.numpy as jnp
from jax.experimental import pallas as pl
from jax.experimental.pallas import tpu as pltpu


# ----------------------------------------------------------------------------
# BlockSpec helpers.
#  _const : whole array, constant block index -> loaded into VMEM once and kept
#           resident across all grid steps (no per-step re-DMA).
#  _step3 : leading axis indexed by the time grid step (block (1, d0, d1)).
# ----------------------------------------------------------------------------
def _const(shape):
    shape = tuple(shape)
    return pl.BlockSpec(shape, lambda t: (0,) * len(shape))


def _step3(trailing):
    trailing = tuple(trailing)
    return pl.BlockSpec((1,) + trailing, lambda t: (t, 0, 0))


# ----------------------------------------------------------------------------
# Fused GRU cell math (PyTorch gate order r, z, n), gates packed along 3H lanes.
# ----------------------------------------------------------------------------
def _gru_combine(gi, gh, h, H):
    r = jax.nn.sigmoid(gi[:, 0:H] + gh[:, 0:H])
    z = jax.nn.sigmoid(gi[:, H:2 * H] + gh[:, H:2 * H])
    n = jnp.tanh(gi[:, 2 * H:3 * H] + r * gh[:, 2 * H:3 * H])
    return (1.0 - z) * n + z * h


def _gru_step(x, h, wi, wh, bi, bh, H):
    gi = jnp.dot(x, wi, preferred_element_type=jnp.float32) + bi
    gh = jnp.dot(h, wh, preferred_element_type=jnp.float32) + bh
    return _gru_combine(gi, gh, h, H)


# ----------------------------------------------------------------------------
# Encoder kernel: grid=(S,) — 2-layer GRU over time, hidden carried in scratch.
# Also emits eproj[t] = h1[t] @ We (attention encoder projection, hoisted here).
# ----------------------------------------------------------------------------
def _encoder_kernel(emb_ref,
                    wi0_ref, wh0_ref, bi0_ref, bh0_ref,
                    wi1_ref, wh1_ref, bi1_ref, bh1_ref,
                    we_ref,
                    enc_out_ref, eproj_ref, h0_fin_ref, h1_fin_ref,
                    h0_s, h1_s, *, hidden_dim):
    t = pl.program_id(0)

    @pl.when(t == 0)
    def _():
        h0_s[...] = jnp.zeros_like(h0_s)
        h1_s[...] = jnp.zeros_like(h1_s)

    x = emb_ref[0]                                                    # (B, E)
    h0 = _gru_step(x, h0_s[...], wi0_ref[...], wh0_ref[...],
                   bi0_ref[...], bh0_ref[...], hidden_dim)
    h1 = _gru_step(h0, h1_s[...], wi1_ref[...], wh1_ref[...],
                   bi1_ref[...], bh1_ref[...], hidden_dim)
    h0_s[...] = h0
    h1_s[...] = h1

    enc_out_ref[0] = h1                                               # (B, H)
    eproj_ref[0] = jnp.dot(h1, we_ref[...],
                           preferred_element_type=jnp.float32)        # (B, H)
    h0_fin_ref[...] = h0                                              # final layer-0 hidden
    h1_fin_ref[...] = h1                                              # final layer-1 hidden


def encoder_forward(emb_seq, enc_p, attn_we):
    S, B, E = emb_seq.shape
    H = enc_p["wh0"].shape[0]
    kernel = functools.partial(_encoder_kernel, hidden_dim=H)
    return pl.pallas_call(
        kernel,
        grid=(S,),
        in_specs=[
            _step3((B, E)),
            _const(enc_p["wi0"].shape), _const(enc_p["wh0"].shape),
            _const(enc_p["bi0"].shape), _const(enc_p["bh0"].shape),
            _const(enc_p["wi1"].shape), _const(enc_p["wh1"].shape),
            _const(enc_p["bi1"].shape), _const(enc_p["bh1"].shape),
            _const(attn_we.shape),
        ],
        out_specs=(
            _step3((B, H)), _step3((B, H)),
            _const((B, H)), _const((B, H)),
        ),
        out_shape=(
            jax.ShapeDtypeStruct((S, B, H), jnp.float32),   # encoder outputs (top layer)
            jax.ShapeDtypeStruct((S, B, H), jnp.float32),   # enc @ We (hoisted projection)
            jax.ShapeDtypeStruct((B, H), jnp.float32),      # final hidden, layer 0
            jax.ShapeDtypeStruct((B, H), jnp.float32),      # final hidden, layer 1
        ),
        scratch_shapes=[pltpu.VMEM((B, H), jnp.float32),
                        pltpu.VMEM((B, H), jnp.float32)],
        compiler_params=pltpu.CompilerParams(dimension_semantics=("arbitrary",)),
    )(emb_seq, enc_p["wi0"], enc_p["wh0"], enc_p["bi0"], enc_p["bh0"],
      enc_p["wi1"], enc_p["wh1"], enc_p["bi1"], enc_p["bh1"], attn_we)


# ----------------------------------------------------------------------------
# Decoder kernel: grid=(T,) — per step: select input embedding (teacher-forced
# vs previous greedy argmax), attention (with hoisted enc projection), 2-layer
# GRU (fused gates), fc_out into a lane-dense padded vocab slab, and the greedy
# argmax -> embedding for the next step. All state in VMEM scratch.
# ----------------------------------------------------------------------------
def _decoder_kernel(use_ref, tf_emb_ref, enc_ref, eproj_ref,
                    h0_init_ref, h1_init_ref,
                    wi0e_ref, wi0c_ref, wh0_ref, bi0_ref, bh0_ref,
                    wi1_ref, wh1_ref, bi1_ref, bh1_ref,
                    awh_ref, ab_ref, av_ref,
                    emb_tab_ref, fcw_ref, fcb_ref,
                    pred_ref,
                    h0_s, h1_s, amax_emb_s, *, hidden_dim, vocab_size):
    t = pl.program_id(0)
    H = hidden_dim

    @pl.when(t == 0)
    def _():
        h0_s[...] = h0_init_ref[...]
        h1_s[...] = h1_init_ref[...]
        amax_emb_s[...] = jnp.zeros_like(amax_emb_s)

    # --- decoder input embedding: teacher-forced token vs previous argmax token ---
    u = use_ref[0]                                                    # (1, 1), 0.0 or 1.0
    embedded = u * tf_emb_ref[0] + (1.0 - u) * amax_emb_s[...]        # (B, E)

    # --- attention (encoder projection hoisted; softmax over the seq axis) ---
    hid = h1_s[...]                                                   # (B, H)
    hproj = jnp.dot(hid, awh_ref[...], preferred_element_type=jnp.float32)       # (B, H)
    energy = jnp.tanh(hproj[:, None, :] + eproj_ref[...] + ab_ref[...][None, :, :])  # (B,S,H)
    scores = jnp.sum(av_ref[...][None, :, :] * energy, axis=-1)       # (B, S)
    scores = scores - jnp.max(scores, axis=-1, keepdims=True)
    e = jnp.exp(scores)
    attn = e * pl.reciprocal(jnp.sum(e, axis=-1, keepdims=True), approx=True)
    ctx = jnp.sum(attn[:, :, None] * enc_ref[...], axis=1)            # (B, H)

    # --- 2-layer GRU, fused r/z/n gate matmuls (concat avoided by splitting Wi of layer 0) ---
    gi0 = (jnp.dot(embedded, wi0e_ref[...], preferred_element_type=jnp.float32)
           + jnp.dot(ctx, wi0c_ref[...], preferred_element_type=jnp.float32)
           + bi0_ref[...])
    gh0 = jnp.dot(h0_s[...], wh0_ref[...], preferred_element_type=jnp.float32) + bh0_ref[...]
    h0 = _gru_combine(gi0, gh0, h0_s[...], H)
    h1 = _gru_step(h0, h1_s[...], wi1_ref[...], wh1_ref[...],
                   bi1_ref[...], bh1_ref[...], H)
    h0_s[...] = h0
    h1_s[...] = h1

    # --- fc_out (vocab padded to 128 lanes for a dense store; sliced back outside) ---
    pred = jnp.dot(h1, fcw_ref[...], preferred_element_type=jnp.float32) + fcb_ref[...]  # (B,Vp)
    pred_ref[0] = pred

    # --- greedy argmax over the real vocab -> embedding for the next (non-TF) step ---
    Vp = pred.shape[-1]
    col = jax.lax.broadcasted_iota(jnp.int32, pred.shape, 1)          # (B, Vp)
    valid = col < vocab_size
    masked = jnp.where(valid, pred, jnp.float32(-1e30))
    m = jnp.max(masked, axis=-1, keepdims=True)                       # (B, 1)
    is_max = jnp.logical_and(masked == m, valid)
    top1 = jnp.min(jnp.where(is_max, col, Vp), axis=-1, keepdims=True)  # (B, 1) int32
    onehot = (col == top1).astype(jnp.float32)                        # (B, Vp)
    amax_emb_s[...] = jnp.dot(onehot, emb_tab_ref[...],
                              preferred_element_type=jnp.float32)     # (B, E)


def decoder_forward(use_teacher, tf_emb_prev, enc_bsh, eproj_bsh, h0, h1,
                    dec_p, attn_p, emb_tab_pad, fcw_pad, fcb_pad, vocab_size):
    T = use_teacher.shape[0]
    B, S, H = enc_bsh.shape
    E = tf_emb_prev.shape[-1]
    Vp = fcw_pad.shape[1]
    kernel = functools.partial(_decoder_kernel, hidden_dim=H, vocab_size=vocab_size)
    return pl.pallas_call(
        kernel,
        grid=(T,),
        in_specs=[
            _step3((1, 1)),                 # use_teacher  (T, 1, 1)
            _step3((B, E)),                 # tf_emb_prev  (T, B, E)
            _const((B, S, H)),              # encoder outputs
            _const((B, S, H)),              # hoisted enc @ We
            _const((B, H)), _const((B, H)),  # initial hidden (layer 0 / layer 1)
            _const(dec_p["wi0e"].shape), _const(dec_p["wi0c"].shape),
            _const(dec_p["wh0"].shape), _const(dec_p["bi0"].shape), _const(dec_p["bh0"].shape),
            _const(dec_p["wi1"].shape), _const(dec_p["wh1"].shape),
            _const(dec_p["bi1"].shape), _const(dec_p["bh1"].shape),
            _const(attn_p["wh"].shape), _const(attn_p["b"].shape), _const(attn_p["v"].shape),
            _const(emb_tab_pad.shape), _const(fcw_pad.shape), _const(fcb_pad.shape),
        ],
        out_specs=_step3((B, Vp)),
        out_shape=jax.ShapeDtypeStruct((T, B, Vp), jnp.float32),
        scratch_shapes=[pltpu.VMEM((B, H), jnp.float32),
                        pltpu.VMEM((B, H), jnp.float32),
                        pltpu.VMEM((B, E), jnp.float32)],
        compiler_params=pltpu.CompilerParams(dimension_semantics=("arbitrary",)),
    )(use_teacher, tf_emb_prev, enc_bsh, eproj_bsh, h0, h1,
      dec_p["wi0e"], dec_p["wi0c"], dec_p["wh0"], dec_p["bi0"], dec_p["bh0"],
      dec_p["wi1"], dec_p["wh1"], dec_p["bi1"], dec_p["bh1"],
      attn_p["wh"], attn_p["b"], attn_p["v"],
      emb_tab_pad, fcw_pad, fcb_pad)


# ----------------------------------------------------------------------------
# Parameter init (deterministic, mimics PyTorch default inits; gates pre-fused).
# ----------------------------------------------------------------------------
def _init_gru_layer(key, in_dim, hidden):
    bound = 1.0 / (hidden ** 0.5)
    ks = jax.random.split(key, 4)
    u = lambda kk, shape: jax.random.uniform(kk, shape, jnp.float32, -bound, bound)
    return {"wi": u(ks[0], (in_dim, 3 * hidden)),   # [Wr | Wz | Wn] packed along 3H
            "wh": u(ks[1], (hidden, 3 * hidden)),
            "bi": u(ks[2], (1, 3 * hidden)),
            "bh": u(ks[3], (1, 3 * hidden))}


def init_params(key, input_size, output_size, embedding_dim, hidden_dim):
    ks = jax.random.split(key, 12)
    E, H, V = embedding_dim, hidden_dim, output_size
    Vp = ((V + 127) // 128) * 128                    # lane-dense padded vocab
    kl = 1.0 / (H ** 0.5)
    kv = 1.0 / ((2 * H) ** 0.5)

    enc0 = _init_gru_layer(ks[2], E, H)
    enc1 = _init_gru_layer(ks[3], H, H)
    dec0 = _init_gru_layer(ks[4], E + H, H)          # input = [embedded ; context]
    dec1 = _init_gru_layer(ks[5], H, H)

    dec_emb = jax.random.normal(ks[1], (V, E), jnp.float32)
    fc_w = jax.random.uniform(ks[10], (H, V), jnp.float32, -kl, kl)
    fc_b = jax.random.uniform(ks[11], (1, V), jnp.float32, -kl, kl)

    return {
        "enc_emb": jax.random.normal(ks[0], (input_size, E), jnp.float32),
        "dec_emb": dec_emb,
        "dec_emb_pad": jnp.zeros((Vp, E), jnp.float32).at[:V].set(dec_emb),
        "enc": {"wi0": enc0["wi"], "wh0": enc0["wh"], "bi0": enc0["bi"], "bh0": enc0["bh"],
                "wi1": enc1["wi"], "wh1": enc1["wh"], "bi1": enc1["bi"], "bh1": enc1["bh"]},
        "dec": {"wi0e": dec0["wi"][:E], "wi0c": dec0["wi"][E:],
                "wh0": dec0["wh"], "bi0": dec0["bi"], "bh0": dec0["bh"],
                "wi1": dec1["wi"], "wh1": dec1["wh"], "bi1": dec1["bi"], "bh1": dec1["bh"]},
        # attention Linear(2H -> H) split into hidden part Wh and encoder part We
        "attn": {"wh": jax.random.uniform(ks[6], (H, H), jnp.float32, -kv, kv),
                 "we": jax.random.uniform(ks[7], (H, H), jnp.float32, -kv, kv),
                 "b": jax.random.uniform(ks[8], (1, H), jnp.float32, -kv, kv),
                 "v": jax.random.uniform(ks[9], (1, H), jnp.float32, 0.0, 1.0)},
        "fc_w_pad": jnp.zeros((H, Vp), jnp.float32).at[:, :V].set(fc_w),
        "fc_b_pad": jnp.zeros((1, Vp), jnp.float32).at[:, :V].set(fc_b),
    }


# ----------------------------------------------------------------------------
# Deterministic teacher-forcing pre-sampling (done OUTSIDE jit, passed as data).
# use_teacher[0] = 1 (start token 0 is always fed); use_teacher[t] = decision at
# step t-1 (teacher token target[:, t-1] vs previous greedy argmax).
# ----------------------------------------------------------------------------
def sample_teacher_forcing(target_len, teacher_forcing_ratio, seed=0):
    rng = random.Random(seed)
    decisions = [rng.random() < teacher_forcing_ratio for _ in range(target_len)]
    use = [1.0] + [1.0 if decisions[t - 1] else 0.0 for t in range(1, target_len)]
    return jnp.asarray(use, jnp.float32).reshape(target_len, 1, 1)


# ----------------------------------------------------------------------------
# Full forward (mirrors Seq2SeqTranslator.forward) — a single jit, 2 pallas_calls.
# ----------------------------------------------------------------------------
@jax.jit
def seq2seq_forward(params, input_seq, target_seq, use_teacher):
    B, S = input_seq.shape
    T = target_seq.shape[1]
    V = params["dec_emb"].shape[0]

    # ---- Encoder: one fused pallas_call over the S time steps ----
    emb_seq = jnp.transpose(jnp.take(params["enc_emb"], input_seq, axis=0), (1, 0, 2))  # (S,B,E)
    enc_out, eproj, h0, h1 = encoder_forward(emb_seq, params["enc"], params["attn"]["we"])
    enc_bsh = jnp.transpose(enc_out, (1, 0, 2))      # (B, S, H)
    eproj_bsh = jnp.transpose(eproj, (1, 0, 2))      # (B, S, H)

    # ---- Decoder: one fused pallas_call over the T time steps ----
    prev_tok = jnp.concatenate(
        [jnp.zeros((B, 1), jnp.int32), target_seq[:, :T - 1].astype(jnp.int32)], axis=1)  # (B,T)
    tf_emb_prev = jnp.transpose(jnp.take(params["dec_emb"], prev_tok, axis=0), (1, 0, 2))  # (T,B,E)
    preds = decoder_forward(use_teacher, tf_emb_prev, enc_bsh, eproj_bsh, h0, h1,
                            params["dec"], params["attn"],
                            params["dec_emb_pad"], params["fc_w_pad"], params["fc_b_pad"], V)
    return jnp.transpose(preds, (1, 0, 2))[:, :, :V]                  # (B, T, V)


# ----------------------------------------------------------------------------
if __name__ == "__main__":
    B, S, T = 2, 8, 6
    INPUT_VOCAB, OUTPUT_VOCAB = 20, 13
    EMB, HID = 16, 32

    key = jax.random.PRNGKey(0)
    k_params, k_in, k_tg = jax.random.split(key, 3)

    params = init_params(k_params, INPUT_VOCAB, OUTPUT_VOCAB, EMB, HID)
    input_seq = jax.random.randint(k_in, (B, S), 0, INPUT_VOCAB, dtype=jnp.int32)
    target_seq = jax.random.randint(k_tg, (B, T), 0, OUTPUT_VOCAB, dtype=jnp.int32)
    use_teacher = sample_teacher_forcing(T, teacher_forcing_ratio=0.5, seed=0)

    outputs = seq2seq_forward(params, input_seq, target_seq, use_teacher)
    outputs = jax.block_until_ready(outputs)
    assert outputs.shape == (B, T, OUTPUT_VOCAB)
    assert bool(jnp.all(jnp.isfinite(outputs)))
    print("KERNEL_OK")
</pallas_src>

<mosaic_0001>
module attributes {stable_mosaic.version = 11 : i64} {
  func.func @_encoder_kernel(%arg0: i32, %arg1: memref<1x2x16xf32, #tpu.memory_space<vmem>>, %arg2: memref<16x96xf32, #tpu.memory_space<vmem>>, %arg3: memref<32x96xf32, #tpu.memory_space<vmem>>, %arg4: memref<1x96xf32, #tpu.memory_space<vmem>>, %arg5: memref<1x96xf32, #tpu.memory_space<vmem>>, %arg6: memref<32x96xf32, #tpu.memory_space<vmem>>, %arg7: memref<32x96xf32, #tpu.memory_space<vmem>>, %arg8: memref<1x96xf32, #tpu.memory_space<vmem>>, %arg9: memref<1x96xf32, #tpu.memory_space<vmem>>, %arg10: memref<32x32xf32, #tpu.memory_space<vmem>>, %arg11: memref<1x2x32xf32, #tpu.memory_space<vmem>>, %arg12: memref<1x2x32xf32, #tpu.memory_space<vmem>>, %arg13: memref<2x32xf32, #tpu.memory_space<vmem>>, %arg14: memref<2x32xf32, #tpu.memory_space<vmem>>, %arg15: memref<2x32xf32, #tpu.memory_space<vmem>>, %arg16: memref<2x32xf32, #tpu.memory_space<vmem>>) attributes {dimension_semantics = [#tpu.dimension_semantics<arbitrary>], iteration_bounds = array<i64: 8>, scalar_prefetch = 0 : i64, scratch_operands = 2 : i64, tpu.core_type = #tpu.core_type<tc>, window_params = [{transform_indices = @transform_0, window_bounds = array<i64: 1, 2, 16>}, {pipeline_mode = #tpu.pipeline_mode<synchronous>, transform_indices = @transform_1, window_bounds = array<i64: 16, 96>}, {pipeline_mode = #tpu.pipeline_mode<synchronous>, transform_indices = @transform_2, window_bounds = array<i64: 32, 96>}, {pipeline_mode = #tpu.pipeline_mode<synchronous>, transform_indices = @transform_3, window_bounds = array<i64: 1, 96>}, {pipeline_mode = #tpu.pipeline_mode<synchronous>, transform_indices = @transform_4, window_bounds = array<i64: 1, 96>}, {pipeline_mode = #tpu.pipeline_mode<synchronous>, transform_indices = @transform_5, window_bounds = array<i64: 32, 96>}, {pipeline_mode = #tpu.pipeline_mode<synchronous>, transform_indices = @transform_6, window_bounds = array<i64: 32, 96>}, {pipeline_mode = #tpu.pipeline_mode<synchronous>, transform_indices = @transform_7, window_bounds = array<i64: 1, 96>}, {pipeline_mode = #tpu.pipeline_mode<synchronous>, transform_indices = @transform_8, window_bounds = array<i64: 1, 96>}, {pipeline_mode = #tpu.pipeline_mode<synchronous>, transform_indices = @transform_9, window_bounds = array<i64: 32, 32>}, {transform_indices = @transform_10, window_bounds = array<i64: 1, 2, 32>}, {transform_indices = @transform_11, window_bounds = array<i64: 1, 2, 32>}, {pipeline_mode = #tpu.pipeline_mode<synchronous>, transform_indices = @transform_12, window_bounds = array<i64: 2, 32>}, {pipeline_mode = #tpu.pipeline_mode<synchronous>, transform_indices = @transform_13, window_bounds = array<i64: 2, 32>}]} {
    %c0_i32 = arith.constant 0 : i32
    %0 = arith.cmpi eq, %arg0, %c0_i32 : i32
    %1 = arith.extui %0 : i1 to i32
    %c0_i32_0 = arith.constant 0 : i32
    %2 = arith.cmpi ne, %1, %c0_i32_0 : i32
    scf.if %2 {
      %cst_49 = arith.constant 0.000000e+00 : f32
      %91 = vector.broadcast %cst_49 : f32 to vector<2x32xf32>
      %c0_50 = arith.constant 0 : index
      %c0_51 = arith.constant 0 : index
      %92 = vector.load %arg15[%c0_50, %c0_51] : memref<2x32xf32, #tpu.memory_space<vmem>>, vector<2x32xf32>
      tpu.vector_store %arg15[%c0_50, %c0_51], %91 {strides = array<i32>} : memref<2x32xf32, #tpu.memory_space<vmem>>, vector<2x32xf32>,
      %cst_52 = arith.constant 0.000000e+00 : f32
      %93 = vector.broadcast %cst_52 : f32 to vector<2x32xf32>
      %c0_53 = arith.constant 0 : index
      %c0_54 = arith.constant 0 : index
      %94 = vector.load %arg16[%c0_53, %c0_54] : memref<2x32xf32, #tpu.memory_space<vmem>>, vector<2x32xf32>
      tpu.vector_store %arg16[%c0_53, %c0_54], %93 {strides = array<i32>} : memref<2x32xf32, #tpu.memory_space<vmem>>, vector<2x32xf32>,
    } else {
    }
    %c0 = arith.constant 0 : index
    %c0_1 = arith.constant 0 : index
    %c0_2 = arith.constant 0 : index
    %3 = vector.load %arg1[%c0, %c0_1, %c0_2] : memref<1x2x16xf32, #tpu.memory_space<vmem>>, vector<1x2x16xf32>
    %4 = vector.shape_cast %3 : vector<1x2x16xf32> to vector<2x16xf32>
    %c0_3 = arith.constant 0 : index
    %c0_4 = arith.constant 0 : index
    %5 = vector.load %arg15[%c0_3, %c0_4] : memref<2x32xf32, #tpu.memory_space<vmem>>, vector<2x32xf32>
    %c0_5 = arith.constant 0 : index
    %c0_6 = arith.constant 0 : index
    %6 = vector.load %arg2[%c0_5, %c0_6] : memref<16x96xf32, #tpu.memory_space<vmem>>, vector<16x96xf32>
    %c0_7 = arith.constant 0 : index
    %c0_8 = arith.constant 0 : index
    %7 = vector.load %arg3[%c0_7, %c0_8] : memref<32x96xf32, #tpu.memory_space<vmem>>, vector<32x96xf32>
    %c0_9 = arith.constant 0 : index
    %c0_10 = arith.constant 0 : index
    %8 = vector.load %arg4[%c0_9, %c0_10] : memref<1x96xf32, #tpu.memory_space<vmem>>, vector<1x96xf32>
    %c0_11 = arith.constant 0 : index
    %c0_12 = arith.constant 0 : index
    %9 = vector.load %arg5[%c0_11, %c0_12] : memref<1x96xf32, #tpu.memory_space<vmem>>, vector<1x96xf32>
    %cst = arith.constant dense<0.000000e+00> : vector<2x96xf32>
    %10 = tpu.matmul %4, %6, %cst {dimension_numbers = #tpu.dot_dimension_numbers<[1], [0], [0], [1], [0, 0, 1, 1], [], []>} : vector<2x16xf32>, vector<16x96xf32>, vector<2x96xf32> -> vector<2x96xf32>
    %11 = vector.broadcast %8 : vector<1x96xf32> to vector<2x96xf32>
    %12 = arith.addf %10, %11 : vector<2x96xf32>
    %cst_13 = arith.constant dense<0.000000e+00> : vector<2x96xf32>
    %13 = tpu.matmul %5, %7, %cst_13 {dimension_numbers = #tpu.dot_dimension_numbers<[1], [0], [0], [1], [0, 0, 1, 1], [], []>} : vector<2x32xf32>, vector<32x96xf32>, vector<2x96xf32> -> vector<2x96xf32>
    %14 = vector.broadcast %9 : vector<1x96xf32> to vector<2x96xf32>
    %15 = arith.addf %13, %14 : vector<2x96xf32>
    %16 = vector.extract_strided_slice %12 {offsets = [0, 0], sizes = [2, 32], strides = [1, 1]} : vector<2x96xf32> to vector<2x32xf32>
    %17 = vector.extract_strided_slice %15 {offsets = [0, 0], sizes = [2, 32], strides = [1, 1]} : vector<2x96xf32> to vector<2x32xf32>
    %18 = arith.addf %16, %17 : vector<2x32xf32>
    %19 = arith.negf %18 : vector<2x32xf32>
    %20 = math.exp %19 : vector<2x32xf32>
    %cst_14 = arith.constant 1.000000e+00 : f32
    %21 = vector.broadcast %cst_14 : f32 to vector<2x32xf32>
    %22 = arith.addf %21, %20 : vector<2x32xf32>
    %23 = arith.divf %21, %22 : vector<2x32xf32>
    %24 = vector.extract_strided_slice %12 {offsets = [0, 32], sizes = [2, 32], strides = [1, 1]} : vector<2x96xf32> to vector<2x32xf32>
    %25 = vector.extract_strided_slice %15 {offsets = [0, 32], sizes = [2, 32], strides = [1, 1]} : vector<2x96xf32> to vector<2x32xf32>
    %26 = arith.addf %24, %25 : vector<2x32xf32>
    %27 = arith.negf %26 : vector<2x32xf32>
    %28 = math.exp %27 : vector<2x32xf32>
    %cst_15 = arith.constant 1.000000e+00 : f32
    %29 = vector.broadcast %cst_15 : f32 to vector<2x32xf32>
    %30 = arith.addf %29, %28 : vector<2x32xf32>
    %31 = arith.divf %29, %30 : vector<2x32xf32>
    %32 = vector.extract_strided_slice %12 {offsets = [0, 64], sizes = [2, 32], strides = [1, 1]} : vector<2x96xf32> to vector<2x32xf32>
    %33 = vector.extract_strided_slice %15 {offsets = [0, 64], sizes = [2, 32], strides = [1, 1]} : vector<2x96xf32> to vector<2x32xf32>
    %34 = arith.mulf %23, %33 : vector<2x32xf32>
    %35 = arith.addf %32, %34 : vector<2x32xf32>
    %36 = math.tanh %35 : vector<2x32xf32>
    %cst_16 = arith.constant 1.000000e+00 : f32
    %37 = vector.broadcast %cst_16 : f32 to vector<2x32xf32>
    %38 = arith.subf %37, %31 : vector<2x32xf32>
    %39 = arith.mulf %38, %36 : vector<2x32xf32>
    %40 = arith.mulf %31, %5 : vector<2x32xf32>
    %41 = arith.addf %39, %40 : vector<2x32xf32>
    %c0_17 = arith.constant 0 : index
    %c0_18 = arith.constant 0 : index
    %42 = vector.load %arg16[%c0_17, %c0_18] : memref<2x32xf32, #tpu.memory_space<vmem>>, vector<2x32xf32>
    %c0_19 = arith.constant 0 : index
    %c0_20 = arith.constant 0 : index
    %43 = vector.load %arg6[%c0_19, %c0_20] : memref<32x96xf32, #tpu.memory_space<vmem>>, vector<32x96xf32>
    %c0_21 = arith.constant 0 : index
    %c0_22 = arith.constant 0 : index
    %44 = vector.load %arg7[%c0_21, %c0_22] : memref<32x96xf32, #tpu.memory_space<vmem>>, vector<32x96xf32>
    %c0_23 = arith.constant 0 : index
    %c0_24 = arith.constant 0 : index
    %45 = vector.load %arg8[%c0_23, %c0_24] : memref<1x96xf32, #tpu.memory_space<vmem>>, vector<1x96xf32>
    %c0_25 = arith.constant 0 : index
    %c0_26 = arith.constant 0 : index
    %46 = vector.load %arg9[%c0_25, %c0_26] : memref<1x96xf32, #tpu.memory_space<vmem>>, vector<1x96xf32>
    %cst_27 = arith.constant dense<0.000000e+00> : vector<2x96xf32>
    %47 = tpu.matmul %41, %43, %cst_27 {dimension_numbers = #tpu.dot_dimension_numbers<[1], [0], [0], [1], [0, 0, 1, 1], [], []>} : vector<2x32xf32>, vector<32x96xf32>, vector<2x96xf32> -> vector<2x96xf32>
    %48 = vector.broadcast %45 : vector<1x96xf32> to vector<2x96xf32>
    %49 = arith.addf %47, %48 : vector<2x96xf32>
    %cst_28 = arith.constant dense<0.000000e+00> : vector<2x96xf32>
    %50 = tpu.matmul %42, %44, %cst_28 {dimension_numbers = #tpu.dot_dimension_numbers<[1], [0], [0], [1], [0, 0, 1, 1], [], []>} : vector<2x32xf32>, vector<32x96xf32>, vector<2x96xf32> -> vector<2x96xf32>
    %51 = vector.broadcast %46 : vector<1x96xf32> to vector<2x96xf32>
    %52 = arith.addf %50, %51 : vector<2x96xf32>
    %53 = vector.extract_strided_slice %49 {offsets = [0, 0], sizes = [2, 32], strides = [1, 1]} : vector<2x96xf32> to vector<2x32xf32>
    %54 = vector.extract_strided_slice %52 {offsets = [0, 0], sizes = [2, 32], strides = [1, 1]} : vector<2x96xf32> to vector<2x32xf32>
    %55 = arith.addf %53, %54 : vector<2x32xf32>
    %56 = arith.negf %55 : vector<2x32xf32>
    %57 = math.exp %56 : vector<2x32xf32>
    %cst_29 = arith.constant 1.000000e+00 : f32
    %58 = vector.broadcast %cst_29 : f32 to vector<2x32xf32>
    %59 = arith.addf %58, %57 : vector<2x32xf32>
    %60 = arith.divf %58, %59 : vector<2x32xf32>
    %61 = vector.extract_strided_slice %49 {offsets = [0, 32], sizes = [2, 32], strides = [1, 1]} : vector<2x96xf32> to vector<2x32xf32>
    %62 = vector.extract_strided_slice %52 {offsets = [0, 32], sizes = [2, 32], strides = [1, 1]} : vector<2x96xf32> to vector<2x32xf32>
    %63 = arith.addf %61, %62 : vector<2x32xf32>
    %64 = arith.negf %63 : vector<2x32xf32>
    %65 = math.exp %64 : vector<2x32xf32>
    %cst_30 = arith.constant 1.000000e+00 : f32
    %66 = vector.broadcast %cst_30 : f32 to vector<2x32xf32>
    %67 = arith.addf %66, %65 : vector<2x32xf32>
    %68 = arith.divf %66, %67 : vector<2x32xf32>
    %69 = vector.extract_strided_slice %49 {offsets = [0, 64], sizes = [2, 32], strides = [1, 1]} : vector<2x96xf32> to vector<2x32xf32>
    %70 = vector.extract_strided_slice %52 {offsets = [0, 64], sizes = [2, 32], strides = [1, 1]} : vector<2x96xf32> to vector<2x32xf32>
    %71 = arith.mulf %60, %70 : vector<2x32xf32>
    %72 = arith.addf %69, %71 : vector<2x32xf32>
    %73 = math.tanh %72 : vector<2x32xf32>
    %cst_31 = arith.constant 1.000000e+00 : f32
    %74 = vector.broadcast %cst_31 : f32 to vector<2x32xf32>
    %75 = arith.subf %74, %68 : vector<2x32xf32>
    %76 = arith.mulf %75, %73 : vector<2x32xf32>
    %77 = arith.mulf %68, %42 : vector<2x32xf32>
    %78 = arith.addf %76, %77 : vector<2x32xf32>
    %c0_32 = arith.constant 0 : index
    %c0_33 = arith.constant 0 : index
    %79 = vector.load %arg15[%c0_32, %c0_33] : memref<2x32xf32, #tpu.memory_space<vmem>>, vector<2x32xf32>
    tpu.vector_store %arg15[%c0_32, %c0_33], %41 {strides = array<i32>} : memref<2x32xf32, #tpu.memory_space<vmem>>, vector<2x32xf32>,
    %c0_34 = arith.constant 0 : index
    %c0_35 = arith.constant 0 : index
    %80 = vector.load %arg16[%c0_34, %c0_35] : memref<2x32xf32, #tpu.memory_space<vmem>>, vector<2x32xf32>
    tpu.vector_store %arg16[%c0_34, %c0_35], %78 {strides = array<i32>} : memref<2x32xf32, #tpu.memory_space<vmem>>, vector<2x32xf32>,
    %c0_36 = arith.constant 0 : index
    %c0_37 = arith.constant 0 : index
    %c0_38 = arith.constant 0 : index
    %81 = vector.load %arg11[%c0_36, %c0_37, %c0_38] : memref<1x2x32xf32, #tpu.memory_space<vmem>>, vector<1x2x32xf32>
    %82 = vector.shape_cast %81 : vector<1x2x32xf32> to vector<2x32xf32>
    %83 = vector.shape_cast %78 : vector<2x32xf32> to vector<1x2x32xf32>
    tpu.vector_store %arg11[%c0_36, %c0_37, %c0_38], %83 {strides = array<i32>} : memref<1x2x32xf32, #tpu.memory_space<vmem>>, vector<1x2x32xf32>,
    %c0_39 = arith.constant 0 : index
    %c0_40 = arith.constant 0 : index
    %84 = vector.load %arg10[%c0_39, %c0_40] : memref<32x32xf32, #tpu.memory_space<vmem>>, vector<32x32xf32>
    %cst_41 = arith.constant dense<0.000000e+00> : vector<2x32xf32>
    %85 = tpu.matmul %78, %84, %cst_41 {dimension_numbers = #tpu.dot_dimension_numbers<[1], [0], [0], [1], [0, 0, 1, 1], [], []>} : vector<2x32xf32>, vector<32x32xf32>, vector<2x32xf32> -> vector<2x32xf32>
    %c0_42 = arith.constant 0 : index
    %c0_43 = arith.constant 0 : index
    %c0_44 = arith.constant 0 : index
    %86 = vector.load %arg12[%c0_42, %c0_43, %c0_44] : memref<1x2x32xf32, #tpu.memory_space<vmem>>, vector<1x2x32xf32>
    %87 = vector.shape_cast %86 : vector<1x2x32xf32> to vector<2x32xf32>
    %88 = vector.shape_cast %85 : vector<2x32xf32> to vector<1x2x32xf32>
    tpu.vector_store %arg12[%c0_42, %c0_43, %c0_44], %88 {strides = array<i32>} : memref<1x2x32xf32, #tpu.memory_space<vmem>>, vector<1x2x32xf32>,
    %c0_45 = arith.constant 0 : index
    %c0_46 = arith.constant 0 : index
    %89 = vector.load %arg13[%c0_45, %c0_46] : memref<2x32xf32, #tpu.memory_space<vmem>>, vector<2x32xf32>
    tpu.vector_store %arg13[%c0_45, %c0_46], %41 {strides = array<i32>} : memref<2x32xf32, #tpu.memory_space<vmem>>, vector<2x32xf32>,
    %c0_47 = arith.constant 0 : index
    %c0_48 = arith.constant 0 : index
    %90 = vector.load %arg14[%c0_47, %c0_48] : memref<2x32xf32, #tpu.memory_space<vmem>>, vector<2x32xf32>
    tpu.vector_store %arg14[%c0_47, %c0_48], %78 {strides = array<i32>} : memref<2x32xf32, #tpu.memory_space<vmem>>, vector<2x32xf32>,
    return
  }
  func.func @transform_0(%arg0: i32) -> (i32, i32, i32) {
    %c0_i32 = arith.constant 0 : i32
    %c0_i32_0 = arith.constant 0 : i32
    %c0_i32_1 = arith.constant 0 : i32
    return %arg0, %c0_i32, %c0_i32_0 : i32, i32, i32
  }
  func.func @transform_1(%arg0: i32) -> (i32, i32) {
    %c0_i32 = arith.constant 0 : i32
    %c0_i32_0 = arith.constant 0 : i32
    %c0_i32_1 = arith.constant 0 : i32
    return %c0_i32, %c0_i32_0 : i32, i32
  }
  func.func @transform_2(%arg0: i32) -> (i32, i32) {
    %c0_i32 = arith.constant 0 : i32
    %c0_i32_0 = arith.constant 0 : i32
    %c0_i32_1 = arith.constant 0 : i32
    return %c0_i32, %c0_i32_0 : i32, i32
  }
  func.func @transform_3(%arg0: i32) -> (i32, i32) {
    %c0_i32 = arith.constant 0 : i32
    %c0_i32_0 = arith.constant 0 : i32
    %c0_i32_1 = arith.constant 0 : i32
    return %c0_i32, %c0_i32_0 : i32, i32
  }
  func.func @transform_4(%arg0: i32) -> (i32, i32) {
    %c0_i32 = arith.constant 0 : i32
    %c0_i32_0 = arith.constant 0 : i32
    %c0_i32_1 = arith.constant 0 : i32
    return %c0_i32, %c0_i32_0 : i32, i32
  }
  func.func @transform_5(%arg0: i32) -> (i32, i32) {
    %c0_i32 = arith.constant 0 : i32
    %c0_i32_0 = arith.constant 0 : i32
    %c0_i32_1 = arith.constant 0 : i32
    return %c0_i32, %c0_i32_0 : i32, i32
  }
  func.func @transform_6(%arg0: i32) -> (i32, i32) {
    %c0_i32 = arith.constant 0 : i32
    %c0_i32_0 = arith.constant 0 : i32
    %c0_i32_1 = arith.constant 0 : i32
    return %c0_i32, %c0_i32_0 : i32, i32
  }
  func.func @transform_7(%arg0: i32) -> (i32, i32) {
    %c0_i32 = arith.constant 0 : i32
    %c0_i32_0 = arith.constant 0 : i32
    %c0_i32_1 = arith.constant 0 : i32
    return %c0_i32, %c0_i32_0 : i32, i32
  }
  func.func @transform_8(%arg0: i32) -> (i32, i32) {
    %c0_i32 = arith.constant 0 : i32
    %c0_i32_0 = arith.constant 0 : i32
    %c0_i32_1 = arith.constant 0 : i32
    return %c0_i32, %c0_i32_0 : i32, i32
  }
  func.func @transform_9(%arg0: i32) -> (i32, i32) {
    %c0_i32 = arith.constant 0 : i32
    %c0_i32_0 = arith.constant 0 : i32
    %c0_i32_1 = arith.constant 0 : i32
    return %c0_i32, %c0_i32_0 : i32, i32
  }
  func.func @transform_10(%arg0: i32) -> (i32, i32, i32) {
    %c0_i32 = arith.constant 0 : i32
    %c0_i32_0 = arith.constant 0 : i32
    %c0_i32_1 = arith.constant 0 : i32
    return %arg0, %c0_i32, %c0_i32_0 : i32, i32, i32
  }
  func.func @transform_11(%arg0: i32) -> (i32, i32, i32) {
    %c0_i32 = arith.constant 0 : i32
    %c0_i32_0 = arith.constant 0 : i32
    %c0_i32_1 = arith.constant 0 : i32
    return %arg0, %c0_i32, %c0_i32_0 : i32, i32, i32
  }
  func.func @transform_12(%arg0: i32) -> (i32, i32) {
    %c0_i32 = arith.constant 0 : i32
    %c0_i32_0 = arith.constant 0 : i32
    %c0_i32_1 = arith.constant 0 : i32
    return %c0_i32, %c0_i32_0 : i32, i32
  }
  func.func @transform_13(%arg0: i32) -> (i32, i32) {
    %c0_i32 = arith.constant 0 : i32
    %c0_i32_0 = arith.constant 0 : i32
    %c0_i32_1 = arith.constant 0 : i32
    return %c0_i32, %c0_i32_0 : i32, i32
  }
}

module attributes {stable_mosaic.version = 11 : i64} {
  func.func @_decoder_kernel(%arg0: i32, %arg1: memref<1x1x1xf32, #tpu.memory_space<vmem>>, %arg2: memref<1x2x16xf32, #tpu.memory_space<vmem>>, %arg3: memref<2x8x32xf32, #tpu.memory_space<vmem>>, %arg4: memref<2x8x32xf32, #tpu.memory_space<vmem>>, %arg5: memref<2x32xf32, #tpu.memory_space<vmem>>, %arg6: memref<2x32xf32, #tpu.memory_space<vmem>>, %arg7: memref<16x96xf32, #tpu.memory_space<vmem>>, %arg8: memref<32x96xf32, #tpu.memory_space<vmem>>, %arg9: memref<32x96xf32, #tpu.memory_space<vmem>>, %arg10: memref<1x96xf32, #tpu.memory_space<vmem>>, %arg11: memref<1x96xf32, #tpu.memory_space<vmem>>, %arg12: memref<32x96xf32, #tpu.memory_space<vmem>>, %arg13: memref<32x96xf32, #tpu.memory_space<vmem>>, %arg14: memref<1x96xf32, #tpu.memory_space<vmem>>, %arg15: memref<1x96xf32, #tpu.memory_space<vmem>>, %arg16: memref<32x32xf32, #tpu.memory_space<vmem>>, %arg17: memref<1x32xf32, #tpu.memory_space<vmem>>, %arg18: memref<1x32xf32, #tpu.memory_space<vmem>>, %arg19: memref<128x16xf32, #tpu.memory_space<vmem>>, %arg20: memref<32x128xf32, #tpu.memory_space<vmem>>, %arg21: memref<1x128xf32, #tpu.memory_space<vmem>>, %arg22: memref<1x2x128xf32, #tpu.memory_space<vmem>>, %arg23: memref<2x32xf32, #tpu.memory_space<vmem>>, %arg24: memref<2x32xf32, #tpu.memory_space<vmem>>, %arg25: memref<2x16xf32, #tpu.memory_space<vmem>>) attributes {dimension_semantics = [#tpu.dimension_semantics<arbitrary>], iteration_bounds = array<i64: 6>, scalar_prefetch = 0 : i64, scratch_operands = 3 : i64, tpu.core_type = #tpu.core_type<tc>, window_params = [{transform_indices = @transform_0, window_bounds = array<i64: 1, 1, 1>}, {transform_indices = @transform_1, window_bounds = array<i64: 1, 2, 16>}, {pipeline_mode = #tpu.pipeline_mode<synchronous>, transform_indices = @transform_2, window_bounds = array<i64: 2, 8, 32>}, {pipeline_mode = #tpu.pipeline_mode<synchronous>, transform_indices = @transform_3, window_bounds = array<i64: 2, 8, 32>}, {pipeline_mode = #tpu.pipeline_mode<synchronous>, transform_indices = @transform_4, window_bounds = array<i64: 2, 32>}, {pipeline_mode = #tpu.pipeline_mode<synchronous>, transform_indices = @transform_5, window_bounds = array<i64: 2, 32>}, {pipeline_mode = #tpu.pipeline_mode<synchronous>, transform_indices = @transform_6, window_bounds = array<i64: 16, 96>}, {pipeline_mode = #tpu.pipeline_mode<synchronous>, transform_indices = @transform_7, window_bounds = array<i64: 32, 96>}, {pipeline_mode = #tpu.pipeline_mode<synchronous>, transform_indices = @transform_8, window_bounds = array<i64: 32, 96>}, {pipeline_mode = #tpu.pipeline_mode<synchronous>, transform_indices = @transform_9, window_bounds = array<i64: 1, 96>}, {pipeline_mode = #tpu.pipeline_mode<synchronous>, transform_indices = @transform_10, window_bounds = array<i64: 1, 96>}, {pipeline_mode = #tpu.pipeline_mode<synchronous>, transform_indices = @transform_11, window_bounds = array<i64: 32, 96>}, {pipeline_mode = #tpu.pipeline_mode<synchronous>, transform_indices = @transform_12, window_bounds = array<i64: 32, 96>}, {pipeline_mode = #tpu.pipeline_mode<synchronous>, transform_indices = @transform_13, window_bounds = array<i64: 1, 96>}, {pipeline_mode = #tpu.pipeline_mode<synchronous>, transform_indices = @transform_14, window_bounds = array<i64: 1, 96>}, {pipeline_mode = #tpu.pipeline_mode<synchronous>, transform_indices = @transform_15, window_bounds = array<i64: 32, 32>}, {pipeline_mode = #tpu.pipeline_mode<synchronous>, transform_indices = @transform_16, window_bounds = array<i64: 1, 32>}, {pipeline_mode = #tpu.pipeline_mode<synchronous>, transform_indices = @transform_17, window_bounds = array<i64: 1, 32>}, {pipeline_mode = #tpu.pipeline_mode<synchronous>, transform_indices = @transform_18, window_bounds = array<i64: 128, 16>}, {pipeline_mode = #tpu.pipeline_mode<synchronous>, transform_indices = @transform_19, window_bounds = array<i64: 32, 128>}, {pipeline_mode = #tpu.pipeline_mode<synchronous>, transform_indices = @transform_20, window_bounds = array<i64: 1, 128>}, {transform_indices = @transform_21, window_bounds = array<i64: 1, 2, 128>}]} {
    %c0_i32 = arith.constant 0 : i32
    %0 = arith.cmpi eq, %arg0, %c0_i32 : i32
    %1 = arith.extui %0 : i1 to i32
    %c0_i32_0 = arith.constant 0 : i32
    %2 = arith.cmpi ne, %1, %c0_i32_0 : i32
    scf.if %2 {
      %c0_82 = arith.constant 0 : index
      %c0_83 = arith.constant 0 : index
      %156 = vector.load %arg5[%c0_82, %c0_83] : memref<2x32xf32, #tpu.memory_space<vmem>>, vector<2x32xf32>
      %c0_84 = arith.constant 0 : index
      %c0_85 = arith.constant 0 : index
      %157 = vector.load %arg23[%c0_84, %c0_85] : memref<2x32xf32, #tpu.memory_space<vmem>>, vector<2x32xf32>
      tpu.vector_store %arg23[%c0_84, %c0_85], %156 {strides = array<i32>} : memref<2x32xf32, #tpu.memory_space<vmem>>, vector<2x32xf32>,
      %c0_86 = arith.constant 0 : index
      %c0_87 = arith.constant 0 : index
      %158 = vector.load %arg6[%c0_86, %c0_87] : memref<2x32xf32, #tpu.memory_space<vmem>>, vector<2x32xf32>
      %c0_88 = arith.constant 0 : index
      %c0_89 = arith.constant 0 : index
      %159 = vector.load %arg24[%c0_88, %c0_89] : memref<2x32xf32, #tpu.memory_space<vmem>>, vector<2x32xf32>
      tpu.vector_store %arg24[%c0_88, %c0_89], %158 {strides = array<i32>} : memref<2x32xf32, #tpu.memory_space<vmem>>, vector<2x32xf32>,
      %cst_90 = arith.constant 0.000000e+00 : f32
      %160 = vector.broadcast %cst_90 : f32 to vector<2x16xf32>
      %c0_91 = arith.constant 0 : index
      %c0_92 = arith.constant 0 : index
      %161 = vector.load %arg25[%c0_91, %c0_92] : memref<2x16xf32, #tpu.memory_space<vmem>>, vector<2x16xf32>
      tpu.vector_store %arg25[%c0_91, %c0_92], %160 {strides = array<i32>} : memref<2x16xf32, #tpu.memory_space<vmem>>, vector<2x16xf32>,
    } else {
    }
    %c0 = arith.constant 0 : index
    %c0_1 = arith.constant 0 : index
    %c0_2 = arith.constant 0 : index
    %3 = vector.load %arg1[%c0, %c0_1, %c0_2] : memref<1x1x1xf32, #tpu.memory_space<vmem>>, vector<1x1x1xf32>
    %4 = vector.shape_cast %3 : vector<1x1x1xf32> to vector<1x1xf32>
    %c0_3 = arith.constant 0 : index
    %c0_4 = arith.constant 0 : index
    %c0_5 = arith.constant 0 : index
    %5 = vector.load %arg2[%c0_3, %c0_4, %c0_5] : memref<1x2x16xf32, #tpu.memory_space<vmem>>, vector<1x2x16xf32>
    %6 = vector.shape_cast %5 : vector<1x2x16xf32> to vector<2x16xf32>
    %7 = vector.broadcast %4 : vector<1x1xf32> to vector<2x16xf32>
    %8 = arith.mulf %7, %6 : vector<2x16xf32>
    %cst = arith.constant 1.000000e+00 : f32
    %9 = vector.broadcast %cst : f32 to vector<1x1xf32>
    %10 = arith.subf %9, %4 : vector<1x1xf32>
    %c0_6 = arith.constant 0 : index
    %c0_7 = arith.constant 0 : index
    %11 = vector.load %arg25[%c0_6, %c0_7] : memref<2x16xf32, #tpu.memory_space<vmem>>, vector<2x16xf32>
    %12 = vector.broadcast %10 : vector<1x1xf32> to vector<2x16xf32>
    %13 = arith.mulf %12, %11 : vector<2x16xf32>
    %14 = arith.addf %8, %13 : vector<2x16xf32>
    %c0_8 = arith.constant 0 : index
    %c0_9 = arith.constant 0 : index
    %15 = vector.load %arg24[%c0_8, %c0_9] : memref<2x32xf32, #tpu.memory_space<vmem>>, vector<2x32xf32>
    %c0_10 = arith.constant 0 : index
    %c0_11 = arith.constant 0 : index
    %16 = vector.load %arg16[%c0_10, %c0_11] : memref<32x32xf32, #tpu.memory_space<vmem>>, vector<32x32xf32>
    %cst_12 = arith.constant dense<0.000000e+00> : vector<2x32xf32>
    %17 = tpu.matmul %15, %16, %cst_12 {dimension_numbers = #tpu.dot_dimension_numbers<[1], [0], [0], [1], [0, 0, 1, 1], [], []>} : vector<2x32xf32>, vector<32x32xf32>, vector<2x32xf32> -> vector<2x32xf32>
    %18 = vector.shape_cast %17 : vector<2x32xf32> to vector<2x1x32xf32>
    %c0_13 = arith.constant 0 : index
    %c0_14 = arith.constant 0 : index
    %c0_15 = arith.constant 0 : index
    %19 = vector.load %arg4[%c0_13, %c0_14, %c0_15] : memref<2x8x32xf32, #tpu.memory_space<vmem>>, vector<2x8x32xf32>
    %20 = vector.broadcast %18 : vector<2x1x32xf32> to vector<2x8x32xf32>
    %21 = arith.addf %20, %19 : vector<2x8x32xf32>
    %c0_16 = arith.constant 0 : index
    %c0_17 = arith.constant 0 : index
    %22 = vector.load %arg17[%c0_16, %c0_17] : memref<1x32xf32, #tpu.memory_space<vmem>>, vector<1x32xf32>
    %23 = vector.shape_cast %22 : vector<1x32xf32> to vector<1x1x32xf32>
    %24 = vector.broadcast %23 : vector<1x1x32xf32> to vector<2x8x32xf32>
    %25 = arith.addf %21, %24 : vector<2x8x32xf32>
    %26 = math.tanh %25 : vector<2x8x32xf32>
    %c0_18 = arith.constant 0 : index
    %c0_19 = arith.constant 0 : index
    %27 = vector.load %arg18[%c0_18, %c0_19] : memref<1x32xf32, #tpu.memory_space<vmem>>, vector<1x32xf32>
    %28 = vector.shape_cast %27 : vector<1x32xf32> to vector<1x1x32xf32>
    %29 = vector.broadcast %28 : vector<1x1x32xf32> to vector<2x8x32xf32>
    %30 = arith.mulf %29, %26 : vector<2x8x32xf32>
    %cst_20 = arith.constant dense<0.000000e+00> : vector<2x8xf32>
    %31 = vector.multi_reduction <add>, %30, %cst_20 [2] : vector<2x8x32xf32> to vector<2x8xf32>
    %cst_21 = arith.constant dense<0xFF800000> : vector<2xf32>
    %32 = vector.multi_reduction <maximumf>, %31, %cst_21 [1] : vector<2x8xf32> to vector<2xf32>
    %33 = vector.shape_cast %32 : vector<2xf32> to vector<2x1xf32>
    %34 = vector.broadcast %33 : vector<2x1xf32> to vector<2x8xf32>
    %35 = arith.subf %31, %34 : vector<2x8xf32>
    %36 = math.exp %35 : vector<2x8xf32>
    %cst_22 = arith.constant dense<0.000000e+00> : vector<2xf32>
    %37 = vector.multi_reduction <add>, %36, %cst_22 [1] : vector<2x8xf32> to vector<2xf32>
    %38 = vector.shape_cast %37 : vector<2xf32> to vector<2x1xf32>
    %39 = tpu.reciprocal %38 {approx = true} : vector<2x1xf32> -> vector<2x1xf32>
    %40 = vector.broadcast %39 : vector<2x1xf32> to vector<2x8xf32>
    %41 = arith.mulf %36, %40 : vector<2x8xf32>
    %42 = vector.shape_cast %41 : vector<2x8xf32> to vector<2x8x1xf32>
    %c0_23 = arith.constant 0 : index
    %c0_24 = arith.constant 0 : index
    %c0_25 = arith.constant 0 : index
    %43 = vector.load %arg3[%c0_23, %c0_24, %c0_25] : memref<2x8x32xf32, #tpu.memory_space<vmem>>, vector<2x8x32xf32>
    %44 = vector.broadcast %42 : vector<2x8x1xf32> to vector<2x8x32xf32>
    %45 = arith.mulf %44, %43 : vector<2x8x32xf32>
    %cst_26 = arith.constant dense<0.000000e+00> : vector<2x32xf32>
    %46 = vector.multi_reduction <add>, %45, %cst_26 [1] : vector<2x8x32xf32> to vector<2x32xf32>
    %c0_27 = arith.constant 0 : index
    %c0_28 = arith.constant 0 : index
    %47 = vector.load %arg7[%c0_27, %c0_28] : memref<16x96xf32, #tpu.memory_space<vmem>>, vector<16x96xf32>
    %cst_29 = arith.constant dense<0.000000e+00> : vector<2x96xf32>
    %48 = tpu.matmul %14, %47, %cst_29 {dimension_numbers = #tpu.dot_dimension_numbers<[1], [0], [0], [1], [0, 0, 1, 1], [], []>} : vector<2x16xf32>, vector<16x96xf32>, vector<2x96xf32> -> vector<2x96xf32>
    %c0_30 = arith.constant 0 : index
    %c0_31 = arith.constant 0 : index
    %49 = vector.load %arg8[%c0_30, %c0_31] : memref<32x96xf32, #tpu.memory_space<vmem>>, vector<32x96xf32>
    %cst_32 = arith.constant dense<0.000000e+00> : vector<2x96xf32>
    %50 = tpu.matmul %46, %49, %cst_32 {dimension_numbers = #tpu.dot_dimension_numbers<[1], [0], [0], [1], [0, 0, 1, 1], [], []>} : vector<2x32xf32>, vector<32x96xf32>, vector<2x96xf32> -> vector<2x96xf32>
    %51 = arith.addf %48, %50 : vector<2x96xf32>
    %c0_33 = arith.constant 0 : index
    %c0_34 = arith.constant 0 : index
    %52 = vector.load %arg10[%c0_33, %c0_34] : memref<1x96xf32, #tpu.memory_space<vmem>>, vector<1x96xf32>
    %53 = vector.broadcast %52 : vector<1x96xf32> to vector<2x96xf32>
    %54 = arith.addf %51, %53 : vector<2x96xf32>
    %c0_35 = arith.constant 0 : index
    %c0_36 = arith.constant 0 : index
    %55 = vector.load %arg23[%c0_35, %c0_36] : memref<2x32xf32, #tpu.memory_space<vmem>>, vector<2x32xf32>
    %c0_37 = arith.constant 0 : index
    %c0_38 = arith.constant 0 : index
    %56 = vector.load %arg9[%c0_37, %c0_38] : memref<32x96xf32, #tpu.memory_space<vmem>>, vector<32x96xf32>
    %cst_39 = arith.constant dense<0.000000e+00> : vector<2x96xf32>
    %57 = tpu.matmul %55, %56, %cst_39 {dimension_numbers = #tpu.dot_dimension_numbers<[1], [0], [0], [1], [0, 0, 1, 1], [], []>} : vector<2x32xf32>, vector<32x96xf32>, vector<2x96xf32> -> vector<2x96xf32>
    %c0_40 = arith.constant 0 : index
    %c0_41 = arith.constant 0 : index
    %58 = vector.load %arg11[%c0_40, %c0_41] : memref<1x96xf32, #tpu.memory_space<vmem>>, vector<1x96xf32>
    %59 = vector.broadcast %58 : vector<1x96xf32> to vector<2x96xf32>
    %60 = arith.addf %57, %59 : vector<2x96xf32>
    %c0_42 = arith.constant 0 : index
    %c0_43 = arith.constant 0 : index
    %61 = vector.load %arg23[%c0_42, %c0_43] : memref<2x32xf32, #tpu.memory_space<vmem>>, vector<2x32xf32>
    %62 = vector.extract_strided_slice %54 {offsets = [0, 0], sizes = [2, 32], strides = [1, 1]} : vector<2x96xf32> to vector<2x32xf32>
    %63 = vector.extract_strided_slice %60 {offsets = [0, 0], sizes = [2, 32], strides = [1, 1]} : vector<2x96xf32> to vector<2x32xf32>
    %64 = arith.addf %62, %63 : vector<2x32xf32>
    %65 = arith.negf %64 : vector<2x32xf32>
    %66 = math.exp %65 : vector<2x32xf32>
    %cst_44 = arith.constant 1.000000e+00 : f32
    %67 = vector.broadcast %cst_44 : f32 to vector<2x32xf32>
    %68 = arith.addf %67, %66 : vector<2x32xf32>
    %69 = arith.divf %67, %68 : vector<2x32xf32>
    %70 = vector.extract_strided_slice %54 {offsets = [0, 32], sizes = [2, 32], strides = [1, 1]} : vector<2x96xf32> to vector<2x32xf32>
    %71 = vector.extract_strided_slice %60 {offsets = [0, 32], sizes = [2, 32], strides = [1, 1]} : vector<2x96xf32> to vector<2x32xf32>
    %72 = arith.addf %70, %71 : vector<2x32xf32>
    %73 = arith.negf %72 : vector<2x32xf32>
    %74 = math.exp %73 : vector<2x32xf32>
    %cst_45 = arith.constant 1.000000e+00 : f32
    %75 = vector.broadcast %cst_45 : f32 to vector<2x32xf32>
    %76 = arith.addf %75, %74 : vector<2x32xf32>
    %77 = arith.divf %75, %76 : vector<2x32xf32>
    %78 = vector.extract_strided_slice %54 {offsets = [0, 64], sizes = [2, 32], strides = [1, 1]} : vector<2x96xf32> to vector<2x32xf32>
    %79 = vector.extract_strided_slice %60 {offsets = [0, 64], sizes = [2, 32], strides = [1, 1]} : vector<2x96xf32> to vector<2x32xf32>
    %80 = arith.mulf %69, %79 : vector<2x32xf32>
    %81 = arith.addf %78, %80 : vector<2x32xf32>
    %82 = math.tanh %81 : vector<2x32xf32>
    %cst_46 = arith.constant 1.000000e+00 : f32
    %83 = vector.broadcast %cst_46 : f32 to vector<2x32xf32>
    %84 = arith.subf %83, %77 : vector<2x32xf32>
    %85 = arith.mulf %84, %82 : vector<2x32xf32>
    %86 = arith.mulf %77, %61 : vector<2x32xf32>
    %87 = arith.addf %85, %86 : vector<2x32xf32>
    %c0_47 = arith.constant 0 : index
    %c0_48 = arith.constant 0 : index
    %88 = vector.load %arg24[%c0_47, %c0_48] : memref<2x32xf32, #tpu.memory_space<vmem>>, vector<2x32xf32>
    %c0_49 = arith.constant 0 : index
    %c0_50 = arith.constant 0 : index
    %89 = vector.load %arg12[%c0_49, %c0_50] : memref<32x96xf32, #tpu.memory_space<vmem>>, vector<32x96xf32>
    %c0_51 = arith.constant 0 : index
    %c0_52 = arith.constant 0 : index
    %90 = vector.load %arg13[%c0_51, %c0_52] : memref<32x96xf32, #tpu.memory_space<vmem>>, vector<32x96xf32>
    %c0_53 = arith.constant 0 : index
    %c0_54 = arith.constant 0 : index
    %91 = vector.load %arg14[%c0_53, %c0_54] : memref<1x96xf32, #tpu.memory_space<vmem>>, vector<1x96xf32>
    %c0_55 = arith.constant 0 : index
    %c0_56 = arith.constant 0 : index
    %92 = vector.load %arg15[%c0_55, %c0_56] : memref<1x96xf32, #tpu.memory_space<vmem>>, vector<1x96xf32>
    %cst_57 = arith.constant dense<0.000000e+00> : vector<2x96xf32>
    %93 = tpu.matmul %87, %89, %cst_57 {dimension_numbers = #tpu.dot_dimension_numbers<[1], [0], [0], [1], [0, 0, 1, 1], [], []>} : vector<2x32xf32>, vector<32x96xf32>, vector<2x96xf32> -> vector<2x96xf32>
    %94 = vector.broadcast %91 : vector<1x96xf32> to vector<2x96xf32>
    %95 = arith.addf %93, %94 : vector<2x96xf32>
    %cst_58 = arith.constant dense<0.000000e+00> : vector<2x96xf32>
    %96 = tpu.matmul %88, %90, %cst_58 {dimension_numbers = #tpu.dot_dimension_numbers<[1], [0], [0], [1], [0, 0, 1, 1], [], []>} : vector<2x32xf32>, vector<32x96xf32>, vector<2x96xf32> -> vector<2x96xf32>
    %97 = vector.broadcast %92 : vector<1x96xf32> to vector<2x96xf32>
    %98 = arith.addf %96, %97 : vector<2x96xf32>
    %99 = vector.extract_strided_slice %95 {offsets = [0, 0], sizes = [2, 32], strides = [1, 1]} : vector<2x96xf32> to vector<2x32xf32>
    %100 = vector.extract_strided_slice %98 {offsets = [0, 0], sizes = [2, 32], strides = [1, 1]} : vector<2x96xf32> to vector<2x32xf32>
    %101 = arith.addf %99, %100 : vector<2x32xf32>
    %102 = arith.negf %101 : vector<2x32xf32>
    %103 = math.exp %102 : vector<2x32xf32>
    %cst_59 = arith.constant 1.000000e+00 : f32
    %104 = vector.broadcast %cst_59 : f32 to vector<2x32xf32>
    %105 = arith.addf %104, %103 : vector<2x32xf32>
    %106 = arith.divf %104, %105 : vector<2x32xf32>
    %107 = vector.extract_strided_slice %95 {offsets = [0, 32], sizes = [2, 32], strides = [1, 1]} : vector<2x96xf32> to vector<2x32xf32>
    %108 = vector.extract_strided_slice %98 {offsets = [0, 32], sizes = [2, 32], strides = [1, 1]} : vector<2x96xf32> to vector<2x32xf32>
    %109 = arith.addf %107, %108 : vector<2x32xf32>
    %110 = arith.negf %109 : vector<2x32xf32>
    %111 = math.exp %110 : vector<2x32xf32>
    %cst_60 = arith.constant 1.000000e+00 : f32
    %112 = vector.broadcast %cst_60 : f32 to vector<2x32xf32>
    %113 = arith.addf %112, %111 : vector<2x32xf32>
    %114 = arith.divf %112, %113 : vector<2x32xf32>
    %115 = vector.extract_strided_slice %95 {offsets = [0, 64], sizes = [2, 32], strides = [1, 1]} : vector<2x96xf32> to vector<2x32xf32>
    %116 = vector.extract_strided_slice %98 {offsets = [0, 64], sizes = [2, 32], strides = [1, 1]} : vector<2x96xf32> to vector<2x32xf32>
    %117 = arith.mulf %106, %116 : vector<2x32xf32>
    %118 = arith.addf %115, %117 : vector<2x32xf32>
    %119 = math.tanh %118 : vector<2x32xf32>
    %cst_61 = arith.constant 1.000000e+00 : f32
    %120 = vector.broadcast %cst_61 : f32 to vector<2x32xf32>
    %121 = arith.subf %120, %114 : vector<2x32xf32>
    %122 = arith.mulf %121, %119 : vector<2x32xf32>
    %123 = arith.mulf %114, %88 : vector<2x32xf32>
    %124 = arith.addf %122, %123 : vector<2x32xf32>
    %c0_62 = arith.constant 0 : index
    %c0_63 = arith.constant 0 : index
    %125 = vector.load %arg23[%c0_62, %c0_63] : memref<2x32xf32, #tpu.memory_space<vmem>>, vector<2x32xf32>
    tpu.vector_store %arg23[%c0_62, %c0_63], %87 {strides = array<i32>} : memref<2x32xf32, #tpu.memory_space<vmem>>, vector<2x32xf32>,
    %c0_64 = arith.constant 0 : index
    %c0_65 = arith.constant 0 : index
    %126 = vector.load %arg24[%c0_64, %c0_65] : memref<2x32xf32, #tpu.memory_space<vmem>>, vector<2x32xf32>
    tpu.vector_store %arg24[%c0_64, %c0_65], %124 {strides = array<i32>} : memref<2x32xf32, #tpu.memory_space<vmem>>, vector<2x32xf32>,
    %c0_66 = arith.constant 0 : index
    %c0_67 = arith.constant 0 : index
    %127 = vector.load %arg20[%c0_66, %c0_67] : memref<32x128xf32, #tpu.memory_space<vmem>>, vector<32x128xf32>
    %cst_68 = arith.constant dense<0.000000e+00> : vector<2x128xf32>
    %128 = tpu.matmul %124, %127, %cst_68 {dimension_numbers = #tpu.dot_dimension_numbers<[1], [0], [0], [1], [0, 0, 1, 1], [], []>} : vector<2x32xf32>, vector<32x128xf32>, vector<2x128xf32> -> vector<2x128xf32>
    %c0_69 = arith.constant 0 : index
    %c0_70 = arith.constant 0 : index
    %129 = vector.load %arg21[%c0_69, %c0_70] : memref<1x128xf32, #tpu.memory_space<vmem>>, vector<1x128xf32>
    %130 = vector.broadcast %129 : vector<1x128xf32> to vector<2x128xf32>
    %131 = arith.addf %128, %130 : vector<2x128xf32>
    %c0_71 = arith.constant 0 : index
    %c0_72 = arith.constant 0 : index
    %c0_73 = arith.constant 0 : index
    %132 = vector.load %arg22[%c0_71, %c0_72, %c0_73] : memref<1x2x128xf32, #tpu.memory_space<vmem>>, vector<1x2x128xf32>
    %133 = vector.shape_cast %132 : vector<1x2x128xf32> to vector<2x128xf32>
    %134 = vector.shape_cast %131 : vector<2x128xf32> to vector<1x2x128xf32>
    tpu.vector_store %arg22[%c0_71, %c0_72, %c0_73], %134 {strides = array<i32>} : memref<1x2x128xf32, #tpu.memory_space<vmem>>, vector<1x2x128xf32>,
    %135 = tpu.iota {dimensions = array<i32: 1>} : vector<2x128xi32>
    %c13_i32 = arith.constant 13 : i32
    %136 = vector.broadcast %c13_i32 : i32 to vector<2x128xi32>
    %137 = arith.cmpi slt, %135, %136 : vector<2x128xi32>
    %cst_74 = arith.constant -1.000000e+30 : f32
    %138 = vector.broadcast %cst_74 : f32 to vector<2x128xf32>
    %139 = arith.select %137, %131, %138 : vector<2x128xi1>, vector<2x128xf32>
    %cst_75 = arith.constant dense<0xFF800000> : vector<2xf32>
    %140 = vector.multi_reduction <maximumf>, %139, %cst_75 [1] : vector<2x128xf32> to vector<2xf32>
    %141 = vector.shape_cast %140 : vector<2xf32> to vector<2x1xf32>
    %142 = vector.broadcast %141 : vector<2x1xf32> to vector<2x128xf32>
    %143 = arith.cmpf oeq, %139, %142 : vector<2x128xf32>
    %144 = arith.andi %143, %137 : vector<2x128xi1>
    %c128_i32 = arith.constant 128 : i32
    %145 = vector.broadcast %c128_i32 : i32 to vector<2x128xi32>
    %146 = arith.select %144, %135, %145 : vector<2x128xi1>, vector<2x128xi32>
    %cst_76 = arith.constant dense<2147483647> : vector<2xi32>
    %147 = vector.multi_reduction <minsi>, %146, %cst_76 [1] : vector<2x128xi32> to vector<2xi32>
    %148 = vector.shape_cast %147 : vector<2xi32> to vector<2x1xi32>
    %149 = vector.broadcast %148 : vector<2x1xi32> to vector<2x128xi32>
    %150 = arith.cmpi eq, %135, %149 : vector<2x128xi32>
    %151 = arith.extui %150 : vector<2x128xi1> to vector<2x128xi32>
    %152 = arith.sitofp %151 : vector<2x128xi32> to vector<2x128xf32>
    %c0_77 = arith.constant 0 : index
    %c0_78 = arith.constant 0 : index
    %153 = vector.load %arg19[%c0_77, %c0_78] : memref<128x16xf32, #tpu.memory_space<vmem>>, vector<128x16xf32>
    %cst_79 = arith.constant dense<0.000000e+00> : vector<2x16xf32>
    %154 = tpu.matmul %152, %153, %cst_79 {dimension_numbers = #tpu.dot_dimension_numbers<[1], [0], [0], [1], [0, 0, 1, 1], [], []>} : vector<2x128xf32>, vector<128x16xf32>, vector<2x16xf32> -> vector<2x16xf32>
    %c0_80 = arith.constant 0 : index
    %c0_81 = arith.constant 0 : index
    %155 = vector.load %arg25[%c0_80, %c0_81] : memref<2x16xf32, #tpu.memory_space<vmem>>, vector<2x16xf32>
    tpu.vector_store %arg25[%c0_80, %c0_81], %154 {strides = array<i32>} : memref<2x16xf32, #tpu.memory_space<vmem>>, vector<2x16xf32>,
    return
  }
  func.func @transform_0(%arg0: i32) -> (i32, i32, i32) {
    %c0_i32 = arith.constant 0 : i32
    %c0_i32_0 = arith.constant 0 : i32
    %c0_i32_1 = arith.constant 0 : i32
    return %arg0, %c0_i32, %c0_i32_0 : i32, i32, i32
  }
  func.func @transform_1(%arg0: i32) -> (i32, i32, i32) {
    %c0_i32 = arith.constant 0 : i32
    %c0_i32_0 = arith.constant 0 : i32
    %c0_i32_1 = arith.constant 0 : i32
    return %arg0, %c0_i32, %c0_i32_0 : i32, i32, i32
  }
  func.func @transform_2(%arg0: i32) -> (i32, i32, i32) {
    %c0_i32 = arith.constant 0 : i32
    %c0_i32_0 = arith.constant 0 : i32
    %c0_i32_1 = arith.constant 0 : i32
    %c0_i32_2 = arith.constant 0 : i32
    return %c0_i32, %c0_i32_0, %c0_i32_1 : i32, i32, i32
  }
  func.func @transform_3(%arg0: i32) -> (i32, i32, i32) {
    %c0_i32 = arith.constant 0 : i32
    %c0_i32_0 = arith.constant 0 : i32
    %c0_i32_1 = arith.constant 0 : i32
    %c0_i32_2 = arith.constant 0 : i32
    return %c0_i32, %c0_i32_0, %c0_i32_1 : i32, i32, i32
  }
  func.func @transform_4(%arg0: i32) -> (i32, i32) {
    %c0_i32 = arith.constant 0 : i32
    %c0_i32_0 = arith.constant 0 : i32
    %c0_i32_1 = arith.constant 0 : i32
    return %c0_i32, %c0_i32_0 : i32, i32
  }
  func.func @transform_5(%arg0: i32) -> (i32, i32) {
    %c0_i32 = arith.constant 0 : i32
    %c0_i32_0 = arith.constant 0 : i32
    %c0_i32_1 = arith.constant 0 : i32
    return %c0_i32, %c0_i32_0 : i32, i32
  }
  func.func @transform_6(%arg0: i32) -> (i32, i32) {
    %c0_i32 = arith.constant 0 : i32
    %c0_i32_0 = arith.constant 0 : i32
    %c0_i32_1 = arith.constant 0 : i32
    return %c0_i32, %c0_i32_0 : i32, i32
  }
  func.func @transform_7(%arg0: i32) -> (i32, i32) {
    %c0_i32 = arith.constant 0 : i32
    %c0_i32_0 = arith.constant 0 : i32
    %c0_i32_1 = arith.constant 0 : i32
    return %c0_i32, %c0_i32_0 : i32, i32
  }
  func.func @transform_8(%arg0: i32) -> (i32, i32) {
    %c0_i32 = arith.constant 0 : i32
    %c0_i32_0 = arith.constant 0 : i32
    %c0_i32_1 = arith.constant 0 : i32
    return %c0_i32, %c0_i32_0 : i32, i32
  }
  func.func @transform_9(%arg0: i32) -> (i32, i32) {
    %c0_i32 = arith.constant 0 : i32
    %c0_i32_0 = arith.constant 0 : i32
    %c0_i32_1 = arith.constant 0 : i32
    return %c0_i32, %c0_i32_0 : i32, i32
  }
  func.func @transform_10(%arg0: i32) -> (i32, i32) {
    %c0_i32 = arith.constant 0 : i32
    %c0_i32_0 = arith.constant 0 : i32
    %c0_i32_1 = arith.constant 0 : i32
    return %c0_i32, %c0_i32_0 : i32, i32
  }
  func.func @transform_11(%arg0: i32) -> (i32, i32) {
    %c0_i32 = arith.constant 0 : i32
    %c0_i32_0 = arith.constant 0 : i32
    %c0_i32_1 = arith.constant 0 : i32
    return %c0_i32, %c0_i32_0 : i32, i32
  }
  func.func @transform_12(%arg0: i32) -> (i32, i32) {
    %c0_i32 = arith.constant 0 : i32
    %c0_i32_0 = arith.constant 0 : i32
    %c0_i32_1 = arith.constant 0 : i32
    return %c0_i32, %c0_i32_0 : i32, i32
  }
  func.func @transform_13(%arg0: i32) -> (i32, i32) {
    %c0_i32 = arith.constant 0 : i32
    %c0_i32_0 = arith.constant 0 : i32
    %c0_i32_1 = arith.constant 0 : i32
    return %c0_i32, %c0_i32_0 : i32, i32
  }
  func.func @transform_14(%arg0: i32) -> (i32, i32) {
    %c0_i32 = arith.constant 0 : i32
    %c0_i32_0 = arith.constant 0 : i32
    %c0_i32_1 = arith.constant 0 : i32
    return %c0_i32, %c0_i32_0 : i32, i32
  }
  func.func @transform_15(%arg0: i32) -> (i32, i32) {
    %c0_i32 = arith.constant 0 : i32
    %c0_i32_0 = arith.constant 0 : i32
    %c0_i32_1 = arith.constant 0 : i32
    return %c0_i32, %c0_i32_0 : i32, i32
  }
  func.func @transform_16(%arg0: i32) -> (i32, i32) {
    %c0_i32 = arith.constant 0 : i32
    %c0_i32_0 = arith.constant 0 : i32
    %c0_i32_1 = arith.constant 0 : i32
    return %c0_i32, %c0_i32_0 : i32, i32
  }
  func.func @transform_17(%arg0: i32) -> (i32, i32) {
    %c0_i32 = arith.constant 0 : i32
    %c0_i32_0 = arith.constant 0 : i32
    %c0_i32_1 = arith.constant 0 : i32
    return %c0_i32, %c0_i32_0 : i32, i32
  }
  func.func @transform_18(%arg0: i32) -> (i32, i32) {
    %c0_i32 = arith.constant 0 : i32
    %c0_i32_0 = arith.constant 0 : i32
    %c0_i32_1 = arith.constant 0 : i32
    return %c0_i32, %c0_i32_0 : i32, i32
  }
  func.func @transform_19(%arg0: i32) -> (i32, i32) {
    %c0_i32 = arith.constant 0 : i32
    %c0_i32_0 = arith.constant 0 : i32
    %c0_i32_1 = arith.constant 0 : i32
    return %c0_i32, %c0_i32_0 : i32, i32
  }
  func.func @transform_20(%arg0: i32) -> (i32, i32) {
    %c0_i32 = arith.constant 0 : i32
    %c0_i32_0 = arith.constant 0 : i32
    %c0_i32_1 = arith.constant 0 : i32
    return %c0_i32, %c0_i32_0 : i32, i32
  }
  func.func @transform_21(%arg0: i32) -> (i32, i32, i32) {
    %c0_i32 = arith.constant 0 : i32
    %c0_i32_0 = arith.constant 0 : i32
    %c0_i32_1 = arith.constant 0 : i32
    return %arg0, %c0_i32, %c0_i32_0 : i32, i32, i32
  }
}

</mosaic_0001>

<bundles_post_ra>
// kernel: seq2seq_forward.2
= control target key start
LH: loop header
LB: loop body
LE: loop exit
PB: predicated region body
PF: predicated region fallthrough
CT: control target
= control target key end

     0   :  { %s923_s25 = smov 0   ;;  %s1050_s0 = inlined_call_operand.vmem [shape: f32[8,2,16], index: 0, kind: input, shape index: {}]   ;;  %s1051_s1 = inlined_call_operand.vmem [shape: f32[16,96], index: 1, kind: input, shape index: {}]   ;;  %s1052_s2 = inlined_call_operand.vmem [shape: f32[32,96], index: 2, kind: input, shape index: {}]   ;;  %s1053_s3 = inlined_call_operand.vmem [shape: f32[1,96], index: 3, kind: input, shape index: {}]   ;;  %s1054_s4 = inlined_call_operand.vmem [shape: f32[1,96], index: 4, kind: input, shape index: {}]   ;;  %s1055_s5 = inlined_call_operand.vmem [shape: f32[32,96], index: 5, kind: input, shape index: {}]   ;;  %s1056_s6 = inlined_call_operand.vmem [shape: f32[32,96], index: 6, kind: input, shape index: {}]   ;;  %s1057_s7 = inlined_call_operand.vmem [shape: f32[1,96], index: 7, kind: input, shape index: {}]   ;;  %s1058_s8 = inlined_call_operand.vmem [shape: f32[1,96], index: 8, kind: input, shape index: {}]   ;;  %s1059_s9 = inlined_call_operand.vmem [shape: f32[32,32], index: 9, kind: input, shape index: {}]   ;;  %s1060_s10 = inlined_call_operand.vmem [shape: f32[8,2,32], index: 10, kind: output, shape index: {0}]   ;;  %s1061_s11 = inlined_call_operand.vmem [shape: f32[8,2,32], index: 11, kind: output, shape index: {1}]   ;;  %s1062_s12 = inlined_call_operand.vmem [shape: f32[2,32], index: 12, kind: output, shape index: {2}]   ;;  %s1063_s13 = inlined_call_operand.vmem [shape: f32[2,32], index: 13, kind: output, shape index: {3}]  }
   0x1 LB: > { %s795_s26 = sadd.s32 4294967295, %s847_s25   ;;  %p799_p0 = scmp.ge.s32.totalorder %s847_s25, 1  ;;  %s847_s25 = sphi %s923_s25, %s24_s25  }
   0x2   : > { %p383_p1 = scmp.lt.s32.totalorder %s847_s25, 9 }
   0x4   : > { %p384_p2 = pnand %p799_p0, %p383_p1 }
   0x5   : > { %p429_p3 = scmp.lt.s32.totalorder (!%p384_p2), %s795_s26, 7  ;;  %p803_p4 = scmp.ne.s32.totalorder (!%p384_p2), %s795_s26, 0 }
   0x6   : > { %387 = sbr.rel (%p384_p2) target bundleno = 1266 (0x4f2), region = 60 }
   0xb   : > { %s430_s27 = scalar_select %p429_p3, %s795_s26, 7 }
   0xc   : > { %444 = sbr.rel (%p803_p4) target bundleno = 20 (0x14), region = 64 }
   0xd   : > { %s931_s28 = sshll.u32 %s430_s27, 1 }
   0xe   : > { %s432_s14 = scalar_lea.vmem %s1050_s0, %s931_s28  ;;  %s436_s17 = scalar_lea.vmem %s1060_s10, %s931_s28 }
   0xf   : > { %s440_s20 = scalar_lea.vmem %s1061_s11, %s931_s28 }
  0x11   : > { %vm445_vm0 = vcmask 254976   ;;  %v849_v0 = vmov 0.0  }
  0x12   : > { %446 = vst.msk [vmem:[#allocation2] sm:$0x3] %vm445_vm0, %v849_v0 }
  0x13   : > { %447 = vst.msk [vmem:[#allocation3] sm:$0x3] %vm445_vm0, %v849_v0 }
  0x14 PF: > { %v455_v1 = vld [vmem:[%s1052_s2 + $0x18] sm:$0xff]  ;;  %v454_v2 = vld [vmem:[%s1052_s2 + $0x10] sm:$0xff]  ;;  %v451_v3 = vld [vmem:[%s1051_s1 + $0x8] sm:$0xff]  ;;  %vm461_vm1 = vcmask 130048   ;;  %vm488_vm2 = vcmask 261120   ;;  %s851_s27 = smov 96  }
  0x15   : > { %504 = vmatpush.msra.mxu1 %v455_v1  ;;  %479 = vmatpush.msra.mxu0 %v451_v3  ;;  %v450_v4 = vld [vmem:[%s1051_s1] sm:$0xff]  ;;  %v453_v5 = vld [vmem:[%s1052_s2 + $0x8] sm:$0xff]  ;;  %s852_s29 = smov 32   ;;  %v562_v34 = vld [vmem:[%s1056_s6 + $0x18] sm:$0xff]  ;;  %vm662_vm7 = vcmask 254976  }
  0x16   : > { %v448_v6 = vld [vmem:[%s432_s14] sm:$0x3]  ;;  %s850_s14 = smov 64   ;;  %v561_v35 = vld [vmem:[%s1056_s6 + $0x10] sm:$0xff]  ;;  %611 = vmatpush.msra.mxu3 %v562_v34  ;;  %v558_v36 = vld [vmem:[%s1055_s5 + $0x18] sm:$0xff] }
  0x17   : > { %505 = vmatpush.msra.mxu1 %v454_v2  ;;  %480 = vmatpush.msra.mxu0 %v450_v4  ;;  %v452_v7 = vld [vmem:[%s1052_s2] sm:$0xff]  ;;  %v560_v37 = vld [vmem:[%s1056_s6 + $0x8] sm:$0xff]  ;;  %v557_v38 = vld [vmem:[%s1055_s5 + $0x10] sm:$0xff] }
  0x18   : > { %804 = vmatmul.msk.f32.vlgmr.msra.gmra.mxu0 %vm461_vm1, %v448_v6  ;;  %v826_v9 = vld [vmem:[%s1054_s4] ss:$0 sm:$0xff]  ;;  %585 = vmatpush.msra.mxu2 %v558_v36  ;;  %v556_v39 = vld [vmem:[%s1055_s5 + $0x8] sm:$0xff] }
  0x19   : > { %506 = vmatpush.msra.mxu1 %v453_v5  ;;  %v449_v8 = vld [vmem:[#allocation2] sm:$0x3]  ;;  %612 = vmatpush.msra.mxu3 %v561_v35 }
  0x1a   : > { %v825_v12 = vld [vmem:[%s1053_s3] ss:$0 sm:$0xff]  ;;  %586 = vmatpush.msra.mxu2 %v557_v38  ;;  %v554_v41 = vld [vmem:[#allocation3] sm:$0x3] }
  0x1b   : > { %507 = vmatpush.msra.mxu1 %v452_v7  ;;  %v559_v40 = vld [vmem:[%s1056_s6] sm:$0xff]  ;;  %613 = vmatpush.msra.mxu3 %v560_v37 }
  0x1c   : > { %805 = vmatmul.msk.f32.vlgmr.msra.gmra.mxu1 %vm488_vm2, %v449_v8  ;;  %v555_v42 = vld [vmem:[%s1055_s5] sm:$0xff]  ;;  %587 = vmatpush.msra.mxu2 %v556_v39 }
  0x1d   : > { %614 = vmatpush.msra.mxu3 %v559_v40  ;;  %v827_v50 = vld [vmem:[%s1058_s8] ss:$0 sm:$0xff] }
  0x1e   : > { %808 = vmatmul.msk.f32.vlgmr.msra.gmra.mxu3 %vm488_vm2, %v554_v41  ;;  %588 = vmatpush.msra.mxu2 %v555_v42  ;;  %v828_v53 = vld [vmem:[%s1057_s7] ss:$0 sm:$0xff] }
  0x95   : > { %v482_v13 = vpop.f32.mrf.mxu0 }
  0x96   : > { %v483_v14 = vadd.f32 %v825_v12, %v482_v13  ;;  %v672_v12 = vld [vmem:[%s1059_s9 + $0x10] sm:$0xff]  ;;  %v671_v13 = vld [vmem:[%s1059_s9 + $0x8] sm:$0xff] }
  0x99   : > { %v509_v10 = vpop.f32.mrf.mxu1 }
  0x9a   : > { %v510_v11 = vadd.f32 %v826_v9, %v509_v10 }
  0x9c   : > { %533 = vrot.lane.b32.xlu0 %v510_v11, %s850_s14  ;;  %v512_v15 = vadd.f32 %v510_v11, %v483_v14  ;;  %v673_v11 = vld [vmem:[%s1059_s9 + $0x18] sm:$0xff] }
  0x9d   : > { %688 = vmatpush.msrb.mxu0 %v673_v11 }
  0x9e   : > { %v806_v16 = vmul.f32 -1.442695, %v512_v15 }
  0x9f   : > { %689 = vmatpush.msrb.mxu0 %v672_v12 }
  0xa0   : > { %829 = vpow2.f32 %v806_v16 }
  0xa1   : > { %v616_v51 = vpop.f32.mrf.mxu3  ;;  %690 = vmatpush.msrb.mxu0 %v671_v13 }
  0xa2   : > { %v617_v52 = vadd.f32 %v827_v50, %v616_v51 }
  0xa6   : > { %v830_v17 = vpop.eup %829 }
  0xa7   : > { %v516_v18 = vadd.f32 1.0, %v830_v17 }
  0xa9   : > { %831 = vrcp.f32 %v516_v18  ;;  %v528_v24 = vand.u32 2147483648, %v516_v18  ;;  %vm522_vm4 = vweird.f32 %v516_v18  ;;  %v526_v25 = vand.u32 2147483647, %v516_v18 }
  0xab   : > { %v529_v27 = vor.u32 1.1754944e-38, %v528_v24  ;;  %vm527_vm6 = vcmp.eq.f32.partialorder %v526_v25, 8.507059e+37 }
  0xaf   : > { %v832_v19 = vpop.eup %831 }
  0xb0   : > { %v518_v20 = vmul.f32 %v832_v19, %v516_v18  ;;  %vm523_vm3 = vweird.f32 %v832_v19 }
  0xb1   : > { %vm524_vm5 = vmor %vm522_vm4, %vm523_vm3 }
  0xb2   : > { %v519_v21 = vsub.f32 1.0, %v518_v20 }
  0xb4   : > { %v520_v22 = vmul.f32 %v832_v19, %v519_v21 }
  0xb6   : > { %v521_v23 = vadd.f32 %v832_v19, %v520_v22 }
  0xb8   : > { %v525_v26 = vsel %vm524_vm5, %v832_v19, %v521_v23 }
  0xb9   : > { %v530_v29 = vsel %vm527_vm6, %v529_v27, %v525_v26 }
  0xba   : > { %v543_v44 = vsub.f32 1.0, %v530_v29 }
 0x10e   : > { %v534_v28 = vpop.permute.xlu0 %533 }
 0x10f   : > { %v536_v30 = vmul.f32 %v534_v28, %v530_v29 }
 0x111   : > { %538 = vrot.lane.b32.xlu0 %v536_v30, %s850_s14 }
 0x183   : > { %v539_v31 = vpop.permute.xlu0 %538 }
 0x184   : > { %v541_v32 = vadd.f32 %v539_v31, %v483_v14  ;;  %v670_v14 = vld [vmem:[%s1059_s9] sm:$0xff] }
 0x185   : > { %691 = vmatpush.msrb.mxu0 %v670_v14 }
 0x186   : > { %833 = vtanh.f32 %v541_v32 }
 0x18c   : > { %v834_v33 = vpop.eup %833 }
 0x18d   : > { %545 = vrot.lane.b32.xlu1 %v834_v33, %s851_s27 }
 0x195   : > { %549 = vrot.lane.b32.xlu1 %v449_v8, %s852_s29 }
 0x1ff   : > { %v546_v43 = vpop.permute.xlu1 %545 }
 0x200   : > { %v548_v46 = vmul.f32 %v546_v43, %v543_v44 }
 0x207   : > { %v550_v45 = vpop.permute.xlu1 %549 }
 0x208   : > { %v552_v47 = vmul.f32 %v550_v45, %v530_v29 }
 0x20a   : > { %v553_v48 = vadd.f32 %v552_v47, %v548_v46 }
 0x20c   : > { %569 = vrot.lane.b32.xlu2 %v553_v48, %s851_s27 }
 0x214   : > { %640 = vrot.lane.b32.xlu2 %v617_v52, %s850_s14 }
 0x21c   : > { %656 = vrot.lane.b32.xlu2 %v554_v41, %s852_s29 }
 0x266   : > { %v570_v49 = vpop.permute.xlu2 %569 }
 0x267   : > { %663 = vst.msk [vmem:[#allocation2] sm:$0x3] %vm662_vm7, %v570_v49  ;;  %807 = vmatmul.msk.f32.vlgmr.msra.gmra.mxu2 %vm488_vm2, %v570_v49 }
 0x268   : > { %697 = vst.msk [vmem:[%s1062_s12] sm:$0x3] %vm662_vm7, %v570_v49 }
 0x26e   : > { %v641_v6 = vpop.permute.xlu2 %640 }
 0x276   : > { %v657_v15 = vpop.permute.xlu2 %656 }
 0x2ea   : > { %v590_v54 = vpop.f32.mrf.mxu2 }
 0x2eb   : > { %v591_v55 = vadd.f32 %v828_v53, %v590_v54 }
 0x2ed   : > { %v619_v56 = vadd.f32 %v617_v52, %v591_v55 }
 0x2ef   : > { %v809_v57 = vmul.f32 -1.442695, %v619_v56 }
 0x2f1   : > { %835 = vpow2.f32 %v809_v57 }
 0x2f7   : > { %v836_v58 = vpop.eup %835 }
 0x2f8   : > { %v623_v59 = vadd.f32 1.0, %v836_v58 }
 0x2fa   : > { %837 = vrcp.f32 %v623_v59  ;;  %v635_v63 = vand.u32 2147483648, %v623_v59  ;;  %v633_v1 = vand.u32 2147483647, %v623_v59  ;;  %vm629_vm9 = vweird.f32 %v623_v59 }
 0x2fc   : > { %v636_v3 = vor.u32 1.1754944e-38, %v635_v63  ;;  %vm634_vm11 = vcmp.eq.f32.partialorder %v633_v1, 8.507059e+37 }
 0x300   : > { %v838_v60 = vpop.eup %837 }
 0x301   : > { %v625_v61 = vmul.f32 %v838_v60, %v623_v59  ;;  %vm630_vm8 = vweird.f32 %v838_v60 }
 0x302   : > { %vm631_vm10 = vmor %vm629_vm9, %vm630_vm8 }
 0x303   : > { %v626_v62 = vsub.f32 1.0, %v625_v61 }
 0x305   : > { %v627_v0 = vmul.f32 %v838_v60, %v626_v62 }
 0x307   : > { %v628_v2 = vadd.f32 %v838_v60, %v627_v0 }
 0x309   : > { %v632_v4 = vsel %vm631_vm10, %v838_v60, %v628_v2 }
 0x30a   : > { %v637_v5 = vsel %vm634_vm11, %v636_v3, %v632_v4 }
 0x30b   : > { %v643_v7 = vmul.f32 %v641_v6, %v637_v5  ;;  %v650_v16 = vsub.f32 1.0, %v637_v5  ;;  %v659_v18 = vmul.f32 %v657_v15, %v637_v5 }
 0x30d   : > { %645 = vrot.lane.b32.xlu0 %v643_v7, %s850_s14 }
 0x37f   : > { %v646_v8 = vpop.permute.xlu0 %645 }
 0x380   : > { %v648_v9 = vadd.f32 %v646_v8, %v591_v55 }
 0x382   : > { %839 = vtanh.f32 %v648_v9 }
 0x388   : > { %v840_v10 = vpop.eup %839 }
 0x389   : > { %652 = vrot.lane.b32.xlu1 %v840_v10, %s851_s27 }
 0x3fb   : > { %v653_v17 = vpop.permute.xlu1 %652 }
 0x3fc   : > { %v655_v19 = vmul.f32 %v653_v17, %v650_v16 }
 0x3fe   : > { %v660_v20 = vadd.f32 %v659_v18, %v655_v19 }
 0x400   : > { %665 = vrot.lane.b32.xlu0 %v660_v20, %s851_s27 }
 0x472   : > { %v666_v21 = vpop.permute.xlu0 %665 }
 0x473   : > { %668 = vst.msk [vmem:[#allocation3] sm:$0x3] %vm662_vm7, %v666_v21  ;;  %810 = vmatmul.msk.f32.vlgmr.msrb.gmra.mxu0 %vm488_vm2, %v666_v21 }
 0x474   : > { %669 = vst.msk [vmem:[%s436_s17] sm:$0x3] %vm662_vm7, %v666_v21 }
 0x475   : > { %698 = vst.msk [vmem:[%s1063_s13] sm:$0x3] %vm662_vm7, %v666_v21 }
 0x4f0   : > { %v693_v22 = vpop.f32.mrf.mxu0 }
 0x4f1   : > { %696 = vst.msk [vmem:[%s440_s20] sm:$0x3] %vm662_vm7, %v693_v22 }
 0x4f2 PF: > { %s24_s25 = sadd.s32 1, %s847_s25  }
 0x4f3   : > { %p21_p5 = scmp.ge.s32.totalorder %s24_s25, 10  }
 0x4f5   :  { %23 = sbr.rel (!%p21_p5) target bundleno = 1 (0x1), region = 122 }

// kernel: seq2seq_forward.3
= control target key start
LH: loop header
LB: loop body
LE: loop exit
PB: predicated region body
PF: predicated region fallthrough
CT: control target
= control target key end

     0   :  { %s1852_s0 = inlined_call_operand.vmem [shape: f32[6,1,1], index: 0, kind: input, shape index: {}]   ;;  %s1853_s1 = inlined_call_operand.vmem [shape: f32[6,2,16], index: 1, kind: input, shape index: {}]   ;;  %s1854_s2 = inlined_call_operand.vmem [shape: f32[2,8,32], index: 2, kind: input, shape index: {}]   ;;  %s1855_s3 = inlined_call_operand.vmem [shape: f32[2,8,32], index: 3, kind: input, shape index: {}]   ;;  %s1856_s4 = inlined_call_operand.vmem [shape: f32[2,32], index: 4, kind: input, shape index: {}]   ;;  %s1857_s5 = inlined_call_operand.vmem [shape: f32[2,32], index: 5, kind: input, shape index: {}]   ;;  %s1858_s6 = inlined_call_operand.vmem [shape: f32[16,96], index: 6, kind: input, shape index: {}]   ;;  %s1859_s7 = inlined_call_operand.vmem [shape: f32[32,96], index: 7, kind: input, shape index: {}]   ;;  %s1860_s8 = inlined_call_operand.vmem [shape: f32[32,96], index: 8, kind: input, shape index: {}]   ;;  %s1861_s9 = inlined_call_operand.vmem [shape: f32[1,96], index: 9, kind: input, shape index: {}]   ;;  %s1862_s10 = inlined_call_operand.vmem [shape: f32[1,96], index: 10, kind: input, shape index: {}]   ;;  %s1863_s11 = inlined_call_operand.vmem [shape: f32[32,96], index: 11, kind: input, shape index: {}]   ;;  %s1864_s12 = inlined_call_operand.vmem [shape: f32[32,96], index: 12, kind: input, shape index: {}]   ;;  %s1865_s13 = inlined_call_operand.vmem [shape: f32[1,96], index: 13, kind: input, shape index: {}]   ;;  %s1866_s14 = inlined_call_operand.vmem [shape: f32[1,96], index: 14, kind: input, shape index: {}]   ;;  %s1867_s15 = inlined_call_operand.vmem [shape: f32[32,32], index: 15, kind: input, shape index: {}]   ;;  %s1868_s16 = inlined_call_operand.vmem [shape: f32[1,32], index: 16, kind: input, shape index: {}]   ;;  %s1869_s17 = inlined_call_operand.vmem [shape: f32[1,32], index: 17, kind: input, shape index: {}]   ;;  %s1870_s18 = inlined_call_operand.vmem [shape: f32[128,16], index: 18, kind: input, shape index: {}]   ;;  %s1871_s19 = inlined_call_operand.vmem [shape: f32[32,128], index: 19, kind: input, shape index: {}]   ;;  %s1872_s20 = inlined_call_operand.vmem [shape: f32[1,128], index: 20, kind: input, shape index: {}]   ;;  %s1873_s21 = inlined_call_operand.hbm [shape: f32[6,2,128], index: 21, kind: output, shape index: {}]  }
   0x1   :  { %1889 = sst [smem:[#allocation16_spill]] %s1852_s0 }
   0x2   :  { %1890 = sst [smem:[#allocation17_spill]] %s1853_s1 }
   0x3   :  { %1891 = sst [smem:[#allocation18_spill]] %s1854_s2 }
   0x4   :  { %1892 = sst [smem:[#allocation19_spill]] %s1855_s3 }
   0x5   :  { %1893 = sst [smem:[#allocation20_spill]] %s1856_s4 }
   0x6   :  { %1894 = sst [smem:[#allocation21_spill]] %s1857_s5 }
   0x7   :  { %1895 = sst [smem:[#allocation22_spill]] %s1858_s6 }
   0x8   :  { %1896 = sst [smem:[#allocation23_spill]] %s1859_s7 }
   0x9   :  { %1897 = sst [smem:[#allocation24_spill]] %s1870_s18 }
   0xa   :  { %1898 = sst [smem:[#allocation25_spill]] %s1872_s20 }
   0xb   :  { %1899 = sst [smem:[#allocation26_spill]] %s1873_s21 }
   0xc   :  { %26 = vsyncpa [#allocation6], 0 }
   0xd   :  { %28 = vsyncpa [#allocation6 + $0x1], 0  ;;  %s1535_s2 = smov 0   ;;  %s1537_s25 = smov 0  }
   0xe   :  { %s1539_s26 = smov 0   ;;  %s1541_s27 = smov 0  }
   0xf LB: > { %1900 = sst [smem:[#allocation8_spill]] %s1405_s2  ;;  %s1556_s3 = sadd.s32 4294967295, %s1417_s27   ;;  %s1417_s27 = sphi %s1541_s27, %s1927_s27   ;;  %s1413_s26 = sphi %s1539_s26, %s1930_s26   ;;  %s1409_s25 = sphi %s1537_s25, %s1929_s25   ;;  %s1405_s2 = sphi %s1535_s2, %s1928_s2  }
  0x10   : > { %1901 = sst [smem:[#allocation9_spill]] %s1409_s25  ;;  %s1255_s28 = sadd.s32 4294967294, %s1417_s27  }
  0x11   : > { %1902 = sst [smem:[#allocation10_spill]] %s1413_s26  ;;  %s1560_s29 = sadd.s32 1, %s1417_s27  }
  0x12   : > { %1903 = sst [smem:[#allocation11_spill]] %s1417_s27  ;;  %s492_s0 = sadd.s32 1, %s1413_s26 }
  0x13   : > { %1904 = sst [smem:[#allocation12_spill]] %s1560_s29  ;;  %s489_s4 = ssub.s32 %s1417_s27, %s1560_s29 }
  0x14   : > { %p502_p0 = scmp.ne.s32.totalorder %s1413_s26, %s1409_s25  ;;  %p490_p1 = scmp.eq.s32.totalorder %s489_s4, 0 }
  0x15   : > { %p503_p2 = scmp.eq.s32.totalorder %s1556_s3, 5  ;;  %p508_p3 = scmp.ne.s32.totalorder %s1409_s25, %s1405_s2 }
  0x16   : > { %p509_p4 = scmp.eq.s32.totalorder %s1255_s28, 5  ;;  %p1258_p7 = scmp.ge.s32.totalorder %s1417_s27, 1 }
  0x17   : > { %s1571_s30 = scalar_select %p490_p1, %s1413_s26, %s492_s0  }
  0x18   : > { %p1573_p5 = por %p503_p2, %p502_p0  ;;  %p1577_p6 = por %p509_p4, %p508_p3 }
  0x19   : > { %1905 = sst [smem:[#allocation13_spill]] %s1571_s30  ;;  %p597_p8 = scmp.lt.s32.totalorder %s1417_s27, 7 }
  0x1a   : > { %s1906_s5 = scalar_select %p1573_p5, 1, 0 }
  0x1b   : > { %s1908_s22 = scalar_select %p1577_p6, 1, 0 }
  0x1c   : > { %1907 = sst [smem:[#allocation14_spill]] %s1906_s5  ;;  %p598_p9 = pnand %p1258_p7, %p597_p8 }
  0x1d   : > { %1909 = sst [smem:[#allocation15_spill]] %s1908_s22  ;;  %s1885_s23 = sand.u32 (!%p598_p9), 1, %s1409_s25  }
  0x1e   : > { %601 = sbr.rel (%p598_p9) target bundleno = 2484 (0x9b4), region = 104  ;;  %p659_p10 = scmp.lt.s32.totalorder (!%p598_p9), %s1556_s3, 5 }
  0x1f   : > { %s1587_s1 = sshll.u32 (!%p598_p9), %s1885_s23, 1  ;;  %s1910_s4 = sld [smem:[#allocation16_spill]] (!%p598_p9) }
  0x20   : > { %s1911_s2 = sld [smem:[#allocation17_spill]] (!%p598_p9)  ;;  %s658_s21 = scalar_lea.vmem (!%p598_p9), [#allocation5], %s1587_s1 }
  0x21   : > { %p1261_p11 = scmp.ne.s32.totalorder (!%p598_p9), %s1556_s3, 0 }
  0x23   : > { %s660_s24 = scalar_select %p659_p10, %s1556_s3, 5 }
  0x24   : > { %669 = sbr.rel (%p1261_p11) target bundleno = 46 (0x2e), region = 108  ;;  %s1912_s25 = sld [smem:[#allocation20_spill]] (!%p1261_p11) }
  0x25   : > { %s1593_s30 = scalar_lea.vmem %s1910_s4, %s660_s24  ;;  %s1260_s26 = sshll.u32 %s660_s24, 1 }
  0x26   : > { %s1598_s27 = scalar_lea.vmem %s1911_s2, %s1260_s26  ;;  %s1913_s28 = sld [smem:[#allocation21_spill]] (!%p1261_p11) }
  0x29   : > { %vm671_vm0 = vcmask 254976   ;;  %vm675_vm1 = vcmask 123904   ;;  %v1419_v2 = vmov 0.0  }
  0x2a   : > { %v670_v0 = vld [vmem:[%s1912_s25] sm:$0x3]  ;;  %676 = vst.msk [vmem:[#allocation4] sm:$0x3] %vm675_vm1, %v1419_v2 }
  0x2b   : > { %672 = vst.msk [vmem:[#allocation2] sm:$0x3] %vm671_vm0, %v670_v0 }
  0x2c   : > { %v673_v1 = vld [vmem:[%s1913_s28] sm:$0x3] }
  0x2d   : > { %674 = vst.msk [vmem:[#allocation3] sm:$0x3] %vm671_vm0, %v673_v1 }
  0x2e PF: > { %v700_v3 = vld [vmem:[%s1867_s15 + $0x18] sm:$0xff]  ;;  %v699_v4 = vld [vmem:[%s1867_s15 + $0x10] sm:$0xff]  ;;  %v698_v5 = vld [vmem:[%s1867_s15 + $0x8] sm:$0xff]  ;;  %vm701_vm2 = vcmask 261120   ;;  %s1914_s0 = sld [smem:[#allocation19_spill]]  ;;  %v757_v27 = vlaneseq  ;;  %vm761_vm3 = vcmask 1041409  }
  0x2f   : > { %717 = vmatpush.msra.mxu0 %v700_v3  ;;  %v697_v6 = vld [vmem:[%s1867_s15] sm:$0xff]  ;;  %vm764_vm4 = vcmask 58368   ;;  %v1420_v34 = vmov 0   ;;  %s1915_s6 = sld [smem:[#allocation22_spill]]  ;;  %vm861_vm5 = vcmask 130048   ;;  %v894_v63 = vld [vmem:[%s1860_s8 + $0x18] sm:$0xff] }
  0x30   : > { %v1325_v12 = vld [vmem:[%s1868_s16] ss:$0 sm:$0xff]  ;;  %v1638_v28 = vand.u32 127, %v757_v27  ;;  %1323 = vset.pattern.permute.xlu2 %v1420_v34  ;;  %1322 = vset.pattern.permute.xlu1 %v1420_v34  ;;  %v893_v0 = vld [vmem:[%s1860_s8 + $0x10] sm:$0xff]  ;;  %v892_v1 = vld [vmem:[%s1860_s8 + $0x8] sm:$0xff]  ;;  %s1916_s7 = sld [smem:[#allocation23_spill]] }
  0x31   : > { %718 = vmatpush.msra.mxu0 %v699_v4  ;;  %v1326_v19 = vld [vmem:[%s1869_s17] ss:$0 sm:$0xff]  ;;  %1324 = vset.pattern.permute.xlu0 %v1420_v34  ;;  %v687_v58 = vld [vmem:[#allocation4] sm:$0x3]  ;;  %s1917_s28 = sld [smem:[#allocation18_spill]]  ;;  %s1421_s22 = smov 64  }
  0x32   : > { %v1327_v35 = vld [vmem:[%s1593_s30] ss:$0 sm:$0xff]  ;;  %s1422_s18 = smov 32   ;;  %s1423_s20 = smov 96   ;;  %vm1068_vm10 = vcmask 254976   ;;  %vm1106_vm15 = vcmp.lt.s32.totalorder %v1638_v28, 13 }
  0x33   : > { %719 = vmatpush.msra.mxu0 %v698_v5  ;;  %v677_v43 = vld [vmem:[%s1593_s30] sm:$0x1]  ;;  %s1918_s25 = sld [smem:[#allocation25_spill]]  ;;  %vm1108_vm0 = vcmask 1041408   ;;  %s1274_s29 = sshll.u32 %s1556_s3, 1 }
  0x34   : > { %v1620_v7 = vld [vmem:[#allocation3] sm:$0x3]  ;;  %v728_v13 = vld [vmem:[%s1914_s0 + $0x8] sm:$0xff]  ;;  %v686_v46 = vsub.f32 1.0, %v677_v43  ;;  %v678_v56 = vld [vmem:[%s1598_s27] sm:$0x3] }
  0x35   : > { %720 = vmatpush.msra.mxu0 %v697_v6  ;;  %v727_v9 = vld [vmem:[%s1914_s0] sm:$0xff]  ;;  %v831_v48 = vld [vmem:[%s1915_s6 + $0x8] sm:$0xff]  ;;  %s1920_s2 = sld [smem:[#allocation9_spill]]  ;;  %s1184_s23 = sshll.u32 %s658_s21, 4  ;;  %s1185_s23 = int_to_ptr.vmem [resolvable:$true] %s1184_s23 }
  0x36   : > { %1262 = vmatmul.msk.f32.vlgmr.msra.gmra.mxu0 %vm701_vm2, %v1620_v7  ;;  %v689_v47 = vperm.slane %v686_v46, 0  ;;  %879 = vmatpush.msra.mxu2 %v831_v48  ;;  %v830_v49 = vld [vmem:[%s1915_s6] sm:$0xff]  ;;  %s1922_s5 = sld [smem:[#allocation26_spill]] }
  0x37   : > { %v891_v2 = vld [vmem:[%s1860_s8] sm:$0xff] }
  0x38   : > { %880 = vmatpush.msra.mxu2 %v830_v49  ;;  %v1669_v3 = vld [vmem:[#allocation2] sm:$0x3] }
  0x3a   : > { %914 = vmatpush.msrb.mxu2 %v894_v63 }
  0x3b   : > { %s1923_s4 = sand.u32 1, %s1920_s2  }
  0x3c   : > { %915 = vmatpush.msrb.mxu2 %v893_v0  ;;  %v971_v0 = vld [vmem:[%s1864_s12 + $0x18] sm:$0xff]  ;;  %s1182_s30 = scalar_lea.hbm %s1922_s5, %s1274_s29  ;;  %s1172_s27 = scalar_lea.sflag [#allocation6], %s1923_s4 }
  0x3d   : > { %1017 = vmatpush.msrb.mxu0 %v971_v0  ;;  %s1186_s24 = sshll.u32 %s1182_s30, 4  ;;  %s1187_s24 = int_to_ptr.hbm [resolvable:$true] %s1186_s24 }
  0x3e   : > { %916 = vmatpush.msrb.mxu2 %v892_v1  ;;  %v970_v1 = vld [vmem:[%s1864_s12 + $0x10] sm:$0xff] }
  0x3f   : > { %1018 = vmatpush.msrb.mxu0 %v970_v1 }
  0x40   : > { %917 = vmatpush.msrb.mxu2 %v891_v2  ;;  %v967_v2 = vld [vmem:[%s1863_s11 + $0x18] sm:$0xff] }
  0xb3   : > { %v722_v8 = vpop.f32.mrf.mxu0 }
  0xb4   : > { %v726_v10 = vrot.slane %v722_v8, 1  ;;  %v729_v11 = vperm.slane %v722_v8, 0 }
  0xb6   : > { %v730_v14 = vperm.slane %v726_v10, 0  ;;  %v733_v15 = vadd.f32 %v729_v11, %v727_v9  ;;  %v835_v11 = vld [vmem:[%s1916_s7 + $0x18] sm:$0xff] }
  0xb7   : > { %853 = vmatpush.msra.mxu1 %v835_v11 }
  0xb8   : > { %v734_v16 = vadd.f32 %v730_v14, %v728_v13  ;;  %v739_v17 = vadd.f32 %v1325_v12, %v733_v15  ;;  %v833_v13 = vld [vmem:[%s1916_s7 + $0x8] sm:$0xff]  ;;  %v832_v14 = vld [vmem:[%s1916_s7] sm:$0xff] }
  0xba   : > { %v740_v18 = vadd.f32 %v1325_v12, %v734_v16  ;;  %1333 = vtanh.f32 %v739_v17  ;;  %v834_v12 = vld [vmem:[%s1916_s7 + $0x10] sm:$0xff]  ;;  %v802_v16 = vld [vmem:[%s1917_s28] sm:$0xff]  ;;  %s1375_s7 = scalar_lea.hbm %s1922_s5, 12 }
  0xbb   : > { %854 = vmatpush.msra.mxu1 %v834_v12 }
  0xbc   : > { %1335 = vtanh.f32 %v740_v18 }
  0xbd   : > { %855 = vmatpush.msra.mxu1 %v833_v13 }
  0xbf   : > { %856 = vmatpush.msra.mxu1 %v832_v14 }
  0xc0   : > { %v1334_v20 = vpop.eup %1333 }
  0xc1   : > { %v747_v21 = vmul.f32 %v1334_v20, %v1326_v19 }
  0xc2   : > { %v1336_v23 = vpop.eup %1335 }
  0xc3   : > { %v749_v22 = vsel %vm701_vm2, %v747_v21, 0.0  ;;  %v748_v24 = vmul.f32 %v1336_v23, %v1326_v19  ;;  %v1328_v19 = vld [vmem:[%s1862_s10] ss:$0 sm:$0xff] }
  0xc4   : > { %750 = vadd.xlane.f32.xlu0 %v749_v22 }
  0xc5   : > { %v752_v25 = vsel %vm701_vm2, %v748_v24, 0.0  ;;  %v803_v24 = vld [vmem:[%s1917_s28 + $0x8] sm:$0xff] }
  0xcc   : > { %753 = vadd.xlane.f32.xlu0 %v752_v25 }
  0xe0   : > { %682 = vperm.xlu0 %1324, %v1327_v35  }
 0x137   : > { %v751_v26 = vpop.xlane.xlu0 %750 }
 0x138   : > { %v759_v30 = vperm.slane %v751_v26, %v1638_v28 }
 0x13f   : > { %v754_v29 = vpop.xlane.xlu0 %753 }
 0x140   : > { %v760_v31 = vperm.slane %v754_v29, %v1638_v28 }
 0x142   : > { %v762_v32 = vsel %vm761_vm3, %v760_v31, %v759_v30 }
 0x143   : > { %v765_v33 = vsel %vm764_vm4, %v762_v32, -inf }
 0x144   : > { %766 = vmax.xlane.f32.xlu1 %v765_v33 }
 0x152   : > { %v683_v57 = vpop.permute.xlu0 %682 }
 0x153   : > { %v685_v59 = vmul.f32 %v683_v57, %v678_v56 }
 0x1b7   : > { %v767_v36 = vpop.xlane.xlu1 %766 }
 0x1b8   : > { %v769_v37 = vperm.slane %v767_v36, 0  ;;  %v770_v38 = vperm.slane %v767_v36, 1 }
 0x1ba   : > { %v773_v39 = vsub.f32 %v751_v26, %v769_v37  ;;  %v774_v40 = vsub.f32 %v754_v29, %v770_v38 }
 0x1bc   : > { %v775_v41 = vmul.f32 1.442695, %v773_v39  ;;  %v777_v42 = vmul.f32 1.442695, %v774_v40 }
 0x1be   : > { %1337 = vpow2.f32 %v775_v41  ;;  %v1329_v41 = vld [vmem:[%s1861_s9] ss:$0 sm:$0xff] }
 0x1bf   : > { %1339 = vpow2.f32 %v777_v42 }
 0x1c4   : > { %v1338_v44 = vpop.eup %1337 }
 0x1c5   : > { %v1340_v45 = vpop.eup %1339  ;;  %782 = vperm.xlu1 %1322, %v1338_v44  }
 0x1c6   : > { %785 = vperm.xlu2 %1323, %v1340_v45  }
 0x1cd   : > { %691 = vperm.xlu1 %1322, %v689_v47  }
 0x220   : > { %v786_v50 = vpop.permute.xlu2 %785 }
 0x221   : > { %v788_v52 = vperm.slane %v786_v50, %v1638_v28 }
 0x237   : > { %v783_v51 = vpop.permute.xlu1 %782 }
 0x238   : > { %v787_v53 = vperm.slane %v783_v51, %v1638_v28 }
 0x23a   : > { %v789_v54 = vsel %vm761_vm3, %v788_v52, %v787_v53 }
 0x23b   : > { %v791_v55 = vsel %vm764_vm4, %v789_v54, 0.0 }
 0x23c   : > { %792 = vadd.xlane.f32.xlu2 %v791_v55 }
 0x23f   : > { %v692_v60 = vpop.permute.xlu1 %691 }
 0x240   : > { %v694_v61 = vmul.f32 %v692_v60, %v687_v58 }
 0x242   : > { %v695_v62 = vadd.f32 %v694_v61, %v685_v59 }
 0x244   : > { %1264 = vmatmul.msk.f32.vlgmr.msra.gmra.mxu2 %vm861_vm5, %v695_v62 }
 0x245   : > { %994 = vmatpush.msra.mxu2 %v967_v2 }
 0x24c   : > { %1265 = vmatmul.msk.f32.vlgmr.msrb.gmra.mxu2 %vm701_vm2, %v1669_v3 }
 0x2af   : > { %v793_v4 = vpop.xlane.xlu2 %792 }
 0x2b0   : > { %1341 = vrcp.f32 %v793_v4  ;;  %v969_v4 = vld [vmem:[%s1864_s12 + $0x8] sm:$0xff] }
 0x2b1   : > { %1019 = vmatpush.msrb.mxu0 %v969_v4 }
 0x2b6   : > { %v1342_v5 = vpop.eup %1341 }
 0x2b7   : > { %v796_v6 = vperm.slane %v1342_v5, 0  ;;  %v797_v9 = vperm.slane %v1342_v5, 1  ;;  %v965_v5 = vld [vmem:[%s1863_s11 + $0x8] sm:$0xff] }
 0x2b9   : > { %v800_v8 = vmul.f32 %v1338_v44, %v796_v6  ;;  %v801_v10 = vmul.f32 %v1340_v45, %v797_v9  ;;  %v968_v6 = vld [vmem:[%s1864_s12] sm:$0xff] }
 0x2ba   : > { %1020 = vmatpush.msrb.mxu0 %v968_v6 }
 0x2bb   : > { %806 = vperm.xlu1 %1322, %v800_v8   ;;  %v964_v8 = vld [vmem:[%s1863_s11] sm:$0xff]  ;;  %1268 = vmatmul.msk.f32.vlgmr.msrb.gmra.mxu0 %vm701_vm2, %v1620_v7 }
 0x2c3   : > { %811 = vperm.xlu1 %1322, %v801_v10  }
 0x2c7   : > { %v882_v15 = vpop.f32.mrf.mxu2 }
 0x2cf   : > { %v919_v22 = vpop.f32.mrf.mxu2 }
 0x2d0   : > { %v920_v25 = vadd.f32 %v1328_v19, %v919_v22  ;;  %v1331_v19 = vld [vmem:[%s1865_s13] ss:$0 sm:$0xff] }
 0x2d2   : > { %943 = vrot.lane.b32.xlu2 %v920_v25, %s1421_s22 }
 0x32c   : > { %v944_v56 = vpop.permute.xlu2 %943 }
 0x32d   : > { %v807_v17 = vpop.permute.xlu1 %806 }
 0x32e   : > { %v814_v18 = vmul.f32 %v807_v17, %v802_v16 }
 0x330   : > { %v816_v20 = vsel %vm701_vm2, %v814_v18, 0.0 }
 0x331   : > { %v817_v21 = vrot.slane %v816_v20, 4 }
 0x333   : > { %v818_v23 = vadd.f32 %v817_v21, %v816_v20 }
 0x335   : > { %v812_v26 = vpop.permute.xlu1 %811  ;;  %v819_v29 = vrot.slane %v818_v23, 2 }
 0x336   : > { %v815_v27 = vmul.f32 %v812_v26, %v803_v24 }
 0x337   : > { %v820_v32 = vadd.f32 %v819_v29, %v818_v23 }
 0x338   : > { %v823_v30 = vsel %vm701_vm2, %v815_v27, 0.0  ;;  %v1022_v16 = vpop.f32.mrf.mxu0 }
 0x339   : > { %v824_v31 = vrot.slane %v823_v30, 4  ;;  %v821_v35 = vrot.slane %v820_v32, 1 }
 0x33b   : > { %v825_v33 = vadd.f32 %v824_v31, %v823_v30  ;;  %v822_v38 = vadd.f32 %v821_v35, %v820_v32 }
 0x33d   : > { %v826_v34 = vrot.slane %v825_v33, 2 }
 0x33f   : > { %v827_v36 = vadd.f32 %v826_v34, %v825_v33 }
 0x341   : > { %v828_v37 = vrot.slane %v827_v36, 1 }
 0x343   : > { %v829_v39 = vadd.f32 %v828_v37, %v827_v36 }
 0x345   : > { %v838_v40 = vsel %vm761_vm3, %v829_v39, %v822_v38 }
 0x346   : > { %1263 = vmatmul.msk.f32.vlgmr.msra.gmra.mxu1 %vm701_vm2, %v838_v40 }
 0x3c3   : > { %v858_v42 = vpop.f32.mrf.mxu1 }
 0x3c4   : > { %v883_v43 = vadd.f32 %v882_v15, %v858_v42  ;;  %v1330_v15 = vld [vmem:[%s1866_s14] ss:$0 sm:$0xff]  ;;  %v1077_v42 = vld [vmem:[%s1871_s19 + $0x10] sm:$0xff] }
 0x3c5   : > { %v1023_v17 = vadd.f32 %v1330_v15, %v1022_v16 }
 0x3c6   : > { %v889_v44 = vadd.f32 %v1329_v41, %v883_v43  ;;  %v1078_v41 = vld [vmem:[%s1871_s19 + $0x18] sm:$0xff]  ;;  %v1076_v43 = vld [vmem:[%s1871_s19 + $0x8] sm:$0xff] }
 0x3c7   : > { %1097 = vmatpush.msrb.mxu1 %v1078_v41 }
 0x3c8   : > { %v922_v45 = vadd.f32 %v920_v25, %v889_v44 }
 0x3c9   : > { %1098 = vmatpush.msrb.mxu1 %v1077_v42 }
 0x3ca   : > { %v1266_v46 = vmul.f32 -1.442695, %v922_v45 }
 0x3cb   : > { %1099 = vmatpush.msrb.mxu1 %v1076_v43 }
 0x3cc   : > { %1343 = vpow2.f32 %v1266_v46 }
 0x3d2   : > { %v1344_v47 = vpop.eup %1343 }
 0x3d3   : > { %v926_v48 = vadd.f32 1.0, %v1344_v47 }
 0x3d5   : > { %1345 = vrcp.f32 %v926_v48  ;;  %v938_v52 = vand.u32 2147483648, %v926_v48  ;;  %v936_v54 = vand.u32 2147483647, %v926_v48  ;;  %vm932_vm7 = vweird.f32 %v926_v48 }
 0x3d7   : > { %v939_v57 = vor.u32 1.1754944e-38, %v938_v52  ;;  %vm937_vm9 = vcmp.eq.f32.partialorder %v936_v54, 8.507059e+37  ;;  %v1332_v52 = vld [vmem:[%s1918_s25] ss:$0 sm:$0xff] }
 0x3db   : > { %v1346_v49 = vpop.eup %1345 }
 0x3dc   : > { %v928_v50 = vmul.f32 %v1346_v49, %v926_v48  ;;  %vm933_vm6 = vweird.f32 %v1346_v49 }
 0x3dd   : > { %vm934_vm8 = vmor %vm932_vm7, %vm933_vm6 }
 0x3de   : > { %v929_v51 = vsub.f32 1.0, %v928_v50 }
 0x3e0   : > { %v930_v53 = vmul.f32 %v1346_v49, %v929_v51 }
 0x3e2   : > { %v931_v55 = vadd.f32 %v1346_v49, %v930_v53 }
 0x3e4   : > { %v935_v58 = vsel %vm934_vm8, %v1346_v49, %v931_v55 }
 0x3e5   : > { %v940_v59 = vsel %vm937_vm9, %v939_v57, %v935_v58 }
 0x3e6   : > { %v946_v60 = vmul.f32 %v944_v56, %v940_v59  ;;  %v953_v10 = vsub.f32 1.0, %v940_v59 }
 0x3e8   : > { %948 = vrot.lane.b32.xlu0 %v946_v60, %s1421_s22 }
 0x3f0   : > { %959 = vrot.lane.b32.xlu0 %v1669_v3, %s1422_s18  ;;  %v966_v3 = vld [vmem:[%s1863_s11 + $0x10] sm:$0xff] }
 0x3f1   : > { %995 = vmatpush.msra.mxu2 %v966_v3 }
 0x3f3   : > { %996 = vmatpush.msra.mxu2 %v965_v5 }
 0x3f5   : > { %997 = vmatpush.msra.mxu2 %v964_v8 }
 0x3f8   : > { %1046 = vrot.lane.b32.xlu0 %v1023_v17, %s1421_s22 }
 0x400   : > { %1062 = vrot.lane.b32.xlu0 %v1620_v7, %s1422_s18  ;;  %s1919_s18 = sld [smem:[#allocation24_spill]] }
 0x406   : > { %v1146_v0 = vld [vmem:[%s1919_s18 + $0x68] sm:$0xff]  ;;  %v1145_v1 = vld [vmem:[%s1919_s18 + $0x60] sm:$0xff]  ;;  %v1144_v2 = vld [vmem:[%s1919_s18 + $0x58] sm:$0xff] }
 0x407   : > { %v1143_v3 = vld [vmem:[%s1919_s18 + $0x50] sm:$0xff]  ;;  %v1142_v4 = vld [vmem:[%s1919_s18 + $0x48] sm:$0xff]  ;;  %v1141_v5 = vld [vmem:[%s1919_s18 + $0x40] sm:$0xff] }
 0x408   : > { %v1140_v6 = vld [vmem:[%s1919_s18 + $0x38] sm:$0xff]  ;;  %v1139_v8 = vld [vmem:[%s1919_s18 + $0x30] sm:$0xff] }
 0x409   : > { %v1135_v16 = vld [vmem:[%s1919_s18 + $0x10] sm:$0xff] }
 0x45a   : > { %v949_v61 = vpop.permute.xlu0 %948 }
 0x45b   : > { %v951_v62 = vadd.f32 %v949_v61, %v889_v44  ;;  %v1075_v44 = vld [vmem:[%s1871_s19] sm:$0xff] }
 0x45c   : > { %1100 = vmatpush.msrb.mxu1 %v1075_v44 }
 0x45d   : > { %1347 = vtanh.f32 %v951_v62  ;;  %v1148_v62 = vld [vmem:[%s1919_s18 + $0x78] sm:$0xff] }
 0x45e   : > { %1149 = vmatpush.msra.mxu3 %v1148_v62 }
 0x462   : > { %v960_v9 = vpop.permute.xlu0 %959 }
 0x463   : > { %v1348_v63 = vpop.eup %1347  ;;  %v962_v12 = vmul.f32 %v960_v9, %v940_v59  ;;  %v1138_v9 = vld [vmem:[%s1919_s18 + $0x28] sm:$0xff] }
 0x464   : > { %955 = vrot.lane.b32.xlu1 %v1348_v63, %s1423_s20  ;;  %v1147_v63 = vld [vmem:[%s1919_s18 + $0x70] sm:$0xff] }
 0x465   : > { %1150 = vmatpush.msra.mxu3 %v1147_v63 }
 0x467   : > { %1151 = vmatpush.msra.mxu3 %v1146_v0 }
 0x469   : > { %1152 = vmatpush.msra.mxu3 %v1145_v1 }
 0x46a   : > { %v1047_v36 = vpop.permute.xlu0 %1046 }
 0x46b   : > { %1153 = vmatpush.msra.mxu3 %v1144_v2 }
 0x46d   : > { %1154 = vmatpush.msra.mxu3 %v1143_v3 }
 0x46f   : > { %1155 = vmatpush.msra.mxu3 %v1142_v4 }
 0x471   : > { %1156 = vmatpush.msra.mxu3 %v1141_v5 }
 0x472   : > { %v1063_v45 = vpop.permute.xlu0 %1062 }
 0x473   : > { %1157 = vmatpush.msra.mxu3 %v1140_v6 }
 0x475   : > { %1158 = vmatpush.msra.mxu3 %v1139_v8 }
 0x477   : > { %1159 = vmatpush.msra.mxu3 %v1138_v9 }
 0x4d6   : > { %v956_v11 = vpop.permute.xlu1 %955 }
 0x4d7   : > { %v958_v13 = vmul.f32 %v956_v11, %v953_v10  ;;  %v1137_v10 = vld [vmem:[%s1919_s18 + $0x20] sm:$0xff]  ;;  %v1136_v11 = vld [vmem:[%s1919_s18 + $0x18] sm:$0xff] }
 0x4d8   : > { %1160 = vmatpush.msra.mxu3 %v1137_v10 }
 0x4d9   : > { %v963_v14 = vadd.f32 %v962_v12, %v958_v13 }
 0x4da   : > { %1161 = vmatpush.msra.mxu3 %v1136_v11 }
 0x4db   : > { %978 = vrot.lane.b32.xlu1 %v963_v14, %s1423_s20 }
 0x4dc   : > { %1162 = vmatpush.msra.mxu3 %v1135_v16 }
 0x54d   : > { %v979_v18 = vpop.permute.xlu1 %978 }
 0x54e   : > { %1069 = vst.msk [vmem:[#allocation2] sm:$0x3] %vm1068_vm10, %v979_v18  ;;  %1267 = vmatmul.msk.f32.vlgmr.msra.gmra.mxu2 %vm701_vm2, %v979_v18  ;;  %v1133_v18 = vld [vmem:[%s1919_s18] sm:$0xff] }
 0x5d1   : > { %v999_v20 = vpop.f32.mrf.mxu2 }
 0x5d2   : > { %v1000_v21 = vadd.f32 %v1331_v19, %v999_v20 }
 0x5d4   : > { %v1025_v22 = vadd.f32 %v1023_v17, %v1000_v21  ;;  %v1134_v17 = vld [vmem:[%s1919_s18 + $0x8] sm:$0xff] }
 0x5d5   : > { %1163 = vmatpush.msra.mxu3 %v1134_v17 }
 0x5d6   : > { %v1269_v23 = vmul.f32 -1.442695, %v1025_v22 }
 0x5d7   : > { %1164 = vmatpush.msra.mxu3 %v1133_v18 }
 0x5d8   : > { %1349 = vpow2.f32 %v1269_v23 }
 0x5de   : > { %v1350_v24 = vpop.eup %1349 }
 0x5df   : > { %v1029_v25 = vadd.f32 1.0, %v1350_v24  ;;  %v1424_v24 = vmov 1.0  }
 0x5e1   : > { %1351 = vrcp.f32 %v1029_v25  ;;  %v1041_v29 = vand.u32 2147483648, %v1029_v25  ;;  %v1039_v31 = vand.u32 2147483647, %v1029_v25  ;;  %vm1035_vm12 = vweird.f32 %v1029_v25 }
 0x5e3   : > { %v1042_v33 = vor.u32 1.1754944e-38, %v1041_v29  ;;  %vm1040_vm14 = vcmp.eq.f32.partialorder %v1039_v31, 8.507059e+37 }
 0x5e7   : > { %v1352_v26 = vpop.eup %1351 }
 0x5e8   : > { %v1031_v27 = vmul.f32 %v1352_v26, %v1029_v25  ;;  %vm1036_vm11 = vweird.f32 %v1352_v26 }
 0x5e9   : > { %vm1037_vm13 = vmor %vm1035_vm12, %vm1036_vm11 }
 0x5ea   : > { %v1032_v7 = vsub.f32 1.0, %v1031_v27 }
 0x5ec   : > { %v1033_v30 = vmul.f32 %v1352_v26, %v1032_v7 }
 0x5ee   : > { %v1034_v32 = vadd.f32 %v1352_v26, %v1033_v30 }
 0x5f0   : > { %v1038_v34 = vsel %vm1037_vm13, %v1352_v26, %v1034_v32 }
 0x5f1   : > { %v1043_v35 = vsel %vm1040_vm14, %v1042_v33, %v1038_v34 }
 0x5f2   : > { %v1049_v37 = vmul.f32 %v1047_v36, %v1043_v35  ;;  %v1056_v46 = vsub.f32 1.0, %v1043_v35  ;;  %v1065_v48 = vmul.f32 %v1063_v45, %v1043_v35 }
 0x5f4   : > { %1051 = vrot.lane.b32.xlu1 %v1049_v37, %s1421_s22  ;;  %s1369_s22 = sshra.s32 %s1187_s24, 4  ;;  %s1370_s22 = int_to_ptr.hbm [resolvable:$true] %s1369_s22 }
 0x5f5   : > { %s1371_s0 = scalar_lea.hbm %s1370_s22, 2  ;;  %p1376_p1 = scmp.lt.s32.totalorder %s1370_s22, %s1922_s5 }
 0x5f6   : > { %p1372_p12 = scmp.ne.s32.totalorder %s1370_s22, %s1371_s0  ;;  %p1377_p2 = scmp.lt.s32.totalorder %s1375_s7, %s1371_s0 }
 0x5f8   : > { %p1373_p13 = pnand %p1372_p12, %p1573_p5  ;;  %p1378_p3 = por %p1377_p2, %p1376_p1 }
 0x5fa   : > { %p1374_p0 = pneg %p1373_p13 }
 0x5fc   : > { %p1379_p4 = pnand %p1378_p3, %p1374_p0 }
 0x666   : > { %v1052_v38 = vpop.permute.xlu1 %1051 }
 0x667   : > { %v1054_v39 = vadd.f32 %v1052_v38, %v1000_v21 }
 0x669   : > { %1353 = vtanh.f32 %v1054_v39 }
 0x66f   : > { %v1354_v40 = vpop.eup %1353 }
 0x670   : > { %1058 = vrot.lane.b32.xlu2 %v1354_v40, %s1423_s20 }
 0x6ca   : > { %v1059_v47 = vpop.permute.xlu2 %1058 }
 0x6cb   : > { %v1061_v49 = vmul.f32 %v1059_v47, %v1056_v46 }
 0x6cd   : > { %v1066_v50 = vadd.f32 %v1065_v48, %v1061_v49 }
 0x6cf   : > { %1071 = vrot.lane.b32.xlu1 %v1066_v50, %s1423_s20 }
 0x741   : > { %v1072_v51 = vpop.permute.xlu1 %1071 }
 0x742   : > { %1074 = vst.msk [vmem:[#allocation3] sm:$0x3] %vm1068_vm10, %v1072_v51  ;;  %1270 = vmatmul.msk.f32.vlgmr.msrb.gmra.mxu1 %vm701_vm2, %v1072_v51 }
 0x7bf   : > { %v1102_v53 = vpop.f32.mrf.mxu1 }
 0x7c0   : > { %v1103_v54 = vadd.f32 %v1332_v52, %v1102_v53 }
 0x7c2   : > { %1105 = vst [vmem:[%s658_s21] sm:$0x3] %v1103_v54  ;;  %v1107_v55 = vsel %vm1106_vm15, %v1103_v54, -1e+30 }
 0x7c3   : > { %v1109_v56 = vsel %vm1108_vm0, %v1107_v55, -inf }
 0x7c4   : > { %1110 = vmax.xlane.f32.xlu2 %v1109_v56 }
 0x837   : > { %v1111_v57 = vpop.xlane.xlu2 %1110 }
 0x838   : > { %vm1112_vm1 = vcmp.eq.f32.partialorder %v1107_v55, %v1111_v57 }
 0x839   : > { %vm1113_vm3 = vmand %vm1112_vm1, %vm1106_vm15 }
 0x83a   : > { %v1114_v58 = vsel %vm1113_vm3, %v1638_v28, 128 }
 0x83b   : > { %v1115_v59 = vsel %vm1108_vm0, %v1114_v58, 2147483647 }
 0x83c   : > { %v1117_v60 = vshra.s32 %v1115_v59, 16  ;;  %v1116_v12 = vand.u32 65535, %v1115_v59 }
 0x83e   : > { %v1119_v61 = vcvt.s32.f32 %v1117_v60  ;;  %v1118_v14 = vcvt.s32.f32 %v1116_v12 }
 0x840   : > { %1120 = vmin.xlane.f32.xlu0 %v1119_v61 }
 0x8b3   : > { %v1121_v13 = vpop.xlane.xlu0 %1120 }
 0x8b4   : > { %vm1122_vm2 = vcmp.eq.f32.partialorder %v1119_v61, %v1121_v13  ;;  %v1127_v19 = vcvt.f32.s32 %v1121_v13 }
 0x8b5   : > { %v1123_v15 = vsel %vm1122_vm2, %v1118_v14, inf }
 0x8b6   : > { %1124 = vmin.xlane.f32.xlu1 %v1123_v15  ;;  %v1128_v21 = vshll.u32 %v1127_v19, 16 }
 0x929   : > { %v1125_v20 = vpop.xlane.xlu1 %1124 }
 0x92a   : > { %v1126_v22 = vcvt.f32.s32 %v1125_v20 }
 0x92c   : > { %v1129_v23 = vadd.s32 %v1128_v21, %v1126_v22 }
 0x92e   : > { %vm1130_vm4 = vcmp.eq.s32.totalorder %v1638_v28, %v1129_v23 }
 0x92f   : > { %1272 = vmatmul.msk.f32.vlgmr.msra.gmra.mxu3 %vm1130_vm4, %v1424_v24 }
 0x930   : > { %1382 = shalt.err (!%p1379_p4)
}
 0x931   : > { %1277 = dma.vmem_to_hbm [thread:$0]  (%p1573_p5), %s1185_s23, 32, %s1187_s24, %s1172_s27   ;;  %vm1169_vm5 = vcmask 123904  }
 0x9b2   : > { %v1166_v28 = vpop.f32.mrf.mxu3 }
 0x9b3   : > { %1170 = vst.msk [vmem:[#allocation4] sm:$0x3] %vm1169_vm5, %v1166_v28 }
 0x9b4 PF: > { %s1924_s21 = sld [smem:[#allocation11_spill]] }
 0x9b5   : > { %s1925_s1 = sld [smem:[#allocation8_spill]] }
 0x9ba   : > { %p1283_p7 = scmp.ge.s32.totalorder %s1924_s21, 2 }
 0x9bb   : > { %s1198_s6 = sand.u32 1, %s1925_s1  }
 0x9bc   : > { %p1280_p8 = pnand %p1283_p7, %p1577_p6  ;;  %s1199_s20 = scalar_lea.sflag [#allocation6], %s1198_s6 }
 0x9be   : > { %p1281_p9 = pneg %p1280_p8 }
 0x9c0   : > { %1400 = dma.done.wait (%p1281_p9), %s1199_s20, 32  }
 0x9c1   : > { %1402 = vsyncadd (%p1281_p9), %s1199_s20, 4294967264  ;;  %s1927_s27 = sld [smem:[#allocation12_spill]] }
 0x9c2   : > { %s1928_s2 = sld [smem:[#allocation9_spill]] }
 0x9c3   : > { %s1929_s25 = sld [smem:[#allocation10_spill]] }
 0x9c4   : > { %s1930_s26 = sld [smem:[#allocation13_spill]] }
 0x9c7   : > { %p31_p5 = scmp.ge.s32.totalorder %s1927_s27, 8  }
 0x9c9   :  { %33 = sbr.rel (!%p31_p5) target bundleno = 15 (0xf), region = 146 }
 0x9ce   :  { %1205 = vsyncpa [#allocation6], 1 }
 0x9cf   :  { %1207 = vsyncpa [#allocation6 + $0x1], 1 }

</bundles_post_ra>
